<compile_context>
chip_gen: v7x
topology: tpu7x:2x2x1
jax: 0.10.0
libtpu: 0.0.40
codegen_flags: <defaults>
</compile_context>

<pallas_src>
import math
import functools

import jax
import jax.numpy as jnp
from jax import lax
from jax.experimental import pallas as pl
from jax.experimental.pallas import tpu as pltpu

# Make the pure-JAX reference use exact f32 matmuls so the tolerance below only
# has to absorb the approx-reciprocal in the Pallas softmax.
jax.config.update("jax_default_matmul_precision", "highest")


# ------------------------------ tiling helpers ------------------------------

def _choose_tile(dim, candidates=(512, 256, 128)):
    """Largest candidate tile that evenly divides `dim`; else the full dim."""
    for t in candidates:
        if dim >= t and dim % t == 0:
            return t
    return dim


_FUSED_VMEM_BUDGET = 40 * 1024 * 1024  # conservative vs. 64 MiB physical on v7x


def _fused_fits_vmem(S, D, n_act_streams):
    """Rough per-grid-step VMEM working-set estimate for the fused path."""
    itm = 4
    act_io = 2 * (n_act_streams + 1) * S * D * itm     # double-buffered acts in/out
    weights = (3 * D * D + D * D + 4 * D) * itm        # resident projection weights
    interm = (3 * S * D + S * S + 2 * S * D) * itm     # qkv + scores + temps (f32)
    return act_io + weights + interm < _FUSED_VMEM_BUDGET


# --------------------------- shared attention math ---------------------------

def _attention_math(q, k, v, heads, head_dim):
    """q/k/v: (S, H*Dh) f32 arrays for one batch -> (S, H*Dh) f32 output."""
    scale = 1.0 / math.sqrt(head_dim)
    outs = []
    for h in range(heads):
        lo = h * head_dim
        hi = lo + head_dim
        qh = q[:, lo:hi] * scale                       # fold 1/sqrt(Dh) into Q
        kh = k[:, lo:hi]
        vh = v[:, lo:hi]

        # scores = (Q * scale) @ K^T without materializing K^T.
        scores = lax.dot_general(qh, kh, (((1,), (1,)), ((), ())),
                                 preferred_element_type=jnp.float32)

        # Numerically stable softmax; reciprocal on the EUP slot.
        m = jnp.max(scores, axis=-1, keepdims=True)
        p = jnp.exp(scores - m)
        p = p * pl.reciprocal(jnp.sum(p, axis=-1, keepdims=True), approx=True)

        outs.append(jnp.dot(p, vh, preferred_element_type=jnp.float32))
    # Single lane-dense result (one full-width store by the caller).
    return jnp.concatenate(outs, axis=-1)


def _out_proj(attn_f32, wo_ref, bo_ref):
    return (jnp.dot(attn_f32, wo_ref[...], preferred_element_type=jnp.float32)
            + bo_ref[...].astype(jnp.float32))


# ----------------------------- fused MHA kernels -----------------------------

def _fused_mha_self_kernel(x_ref, wqkv_ref, bqkv_ref, wo_ref, bo_ref, o_ref,
                           *, heads, head_dim):
    # x_ref: (S, D); wqkv: (D, 3D); wo: (D, D); o: (S, D) -- one batch element.
    D = heads * head_dim
    qkv = (jnp.dot(x_ref[...], wqkv_ref[...], preferred_element_type=jnp.float32)
           + bqkv_ref[...].astype(jnp.float32))
    attn = _attention_math(qkv[:, 0:D], qkv[:, D:2 * D], qkv[:, 2 * D:3 * D],
                           heads, head_dim)
    o_ref[...] = _out_proj(attn, wo_ref, bo_ref).astype(o_ref.dtype)


def _fused_mha_cross_kernel(q_ref, k_ref, v_ref,
                            wq_ref, bq_ref, wk_ref, bk_ref, wv_ref, bv_ref,
                            wo_ref, bo_ref, o_ref, *, heads, head_dim):
    def proj(x_ref, w_ref, b_ref):
        return (jnp.dot(x_ref[...], w_ref[...], preferred_element_type=jnp.float32)
                + b_ref[...].astype(jnp.float32))

    attn = _attention_math(proj(q_ref, wq_ref, bq_ref),
                           proj(k_ref, wk_ref, bk_ref),
                           proj(v_ref, wv_ref, bv_ref),
                           heads, head_dim)
    o_ref[...] = _out_proj(attn, wo_ref, bo_ref).astype(o_ref.dtype)


# ------------------------ fallback kernels (tiled path) ----------------------

def _linear_kernel(x_ref, w_ref, b_ref, o_ref, acc_ref):
    # Grid: (M/tm, N/tn, K/tk); K axis is the reduction ("arbitrary").
    k = pl.program_id(2)

    @pl.when(k == 0)
    def _init():
        acc_ref[...] = jnp.zeros_like(acc_ref)

    acc_ref[...] += jnp.dot(x_ref[...], w_ref[...],
                            preferred_element_type=jnp.float32)

    @pl.when(k == pl.num_programs(2) - 1)
    def _finalize():
        o_ref[...] = (acc_ref[...] + b_ref[...].astype(jnp.float32)).astype(o_ref.dtype)


def _attn_outproj_kernel_fusedqkv(qkv_ref, wo_ref, bo_ref, o_ref, *, heads, head_dim):
    # qkv_ref: (S, 3D) for the current batch; [Q | K | V] along lanes.
    D = heads * head_dim
    qkv = qkv_ref[...].astype(jnp.float32)
    attn = _attention_math(qkv[:, 0:D], qkv[:, D:2 * D], qkv[:, 2 * D:3 * D],
                           heads, head_dim)
    o_ref[...] = _out_proj(attn, wo_ref, bo_ref).astype(o_ref.dtype)


def _attn_outproj_kernel_split(q_ref, k_ref, v_ref, wo_ref, bo_ref, o_ref,
                               *, heads, head_dim):
    attn = _attention_math(q_ref[...].astype(jnp.float32),
                           k_ref[...].astype(jnp.float32),
                           v_ref[...].astype(jnp.float32),
                           heads, head_dim)
    o_ref[...] = _out_proj(attn, wo_ref, bo_ref).astype(o_ref.dtype)


# ------------------------------- wrappers ------------------------------------

def _attn_cost(B, S, heads, head_dim, proj_flops, in_elems, out_elems):
    D = heads * head_dim
    return pl.CostEstimate(
        flops=proj_flops + 4 * B * heads * S * S * head_dim + 2 * B * S * D * D,
        transcendentals=B * heads * S * S,
        bytes_accessed=4 * (in_elems + out_elems),
    )


def pallas_mha_self_fused(x, w_qkv, b_qkv, wo, bo, heads, head_dim):
    """Fully fused self-attention: (B, S, D) -> (B, S, D), one pallas_call."""
    B, S, D = x.shape
    kernel = functools.partial(_fused_mha_self_kernel, heads=heads, head_dim=head_dim)
    cost = _attn_cost(B, S, heads, head_dim,
                      proj_flops=2 * B * S * D * 3 * D,
                      in_elems=B * S * D + 3 * D * D + D * D + 4 * D,
                      out_elems=B * S * D)
    return pl.pallas_call(
        kernel,
        out_shape=jax.ShapeDtypeStruct((B, S, D), x.dtype),
        grid=(B,),
        in_specs=[
            pl.BlockSpec((None, S, D), lambda b: (b, 0, 0)),
            pl.BlockSpec((D, 3 * D), lambda b: (0, 0)),   # resident across batch
            pl.BlockSpec((1, 3 * D), lambda b: (0, 0)),
            pl.BlockSpec((D, D), lambda b: (0, 0)),
            pl.BlockSpec((1, D), lambda b: (0, 0)),
        ],
        out_specs=pl.BlockSpec((None, S, D), lambda b: (b, 0, 0)),
        compiler_params=pltpu.CompilerParams(
            dimension_semantics=("parallel",),
            vmem_limit_bytes=64 * 1024 * 1024),
        cost_estimate=cost,
    )(x, w_qkv, b_qkv.reshape(1, 3 * D), wo, bo.reshape(1, D))


def pallas_mha_cross_fused(q, k, v, wq, bq, wk, bk, wv, bv, wo, bo, heads, head_dim):
    """Fully fused cross-attention: three (B, S, D) inputs -> (B, S, D)."""
    B, S, D = q.shape
    kernel = functools.partial(_fused_mha_cross_kernel, heads=heads, head_dim=head_dim)
    act_spec = pl.BlockSpec((None, S, D), lambda b: (b, 0, 0))
    w_spec = pl.BlockSpec((D, D), lambda b: (0, 0))
    b_spec = pl.BlockSpec((1, D), lambda b: (0, 0))
    cost = _attn_cost(B, S, heads, head_dim,
                      proj_flops=3 * 2 * B * S * D * D,
                      in_elems=3 * B * S * D + 4 * D * D + 4 * D,
                      out_elems=B * S * D)
    return pl.pallas_call(
        kernel,
        out_shape=jax.ShapeDtypeStruct((B, S, D), q.dtype),
        grid=(B,),
        in_specs=[act_spec, act_spec, act_spec,
                  w_spec, b_spec, w_spec, b_spec, w_spec, b_spec,
                  w_spec, b_spec],
        out_specs=act_spec,
        compiler_params=pltpu.CompilerParams(
            dimension_semantics=("parallel",),
            vmem_limit_bytes=64 * 1024 * 1024),
        cost_estimate=cost,
    )(q, k, v, wq, bq.reshape(1, D), wk, bk.reshape(1, D), wv, bv.reshape(1, D),
      wo, bo.reshape(1, D))


def pallas_linear(x, w, b):
    """y = x @ w + b with a tiled, double-buffered matmul pipeline (fallback)."""
    M, K = x.shape
    K2, N = w.shape
    assert K == K2
    tm = _choose_tile(M)
    tn = _choose_tile(N)
    tk = _choose_tile(K)
    grid = (M // tm, N // tn, K // tk)

    cost = pl.CostEstimate(
        flops=2 * M * N * K,
        transcendentals=0,
        bytes_accessed=4 * (M * K + K * N + M * N + N),
    )

    return pl.pallas_call(
        _linear_kernel,
        out_shape=jax.ShapeDtypeStruct((M, N), x.dtype),
        grid=grid,
        in_specs=[
            pl.BlockSpec((tm, tk), lambda i, j, kk: (i, kk)),
            pl.BlockSpec((tk, tn), lambda i, j, kk: (kk, j)),
            pl.BlockSpec((1, tn), lambda i, j, kk: (0, j)),
        ],
        out_specs=pl.BlockSpec((tm, tn), lambda i, j, kk: (i, j)),
        scratch_shapes=[pltpu.VMEM((tm, tn), jnp.float32)],
        compiler_params=pltpu.CompilerParams(
            dimension_semantics=("parallel", "parallel", "arbitrary")),
        cost_estimate=cost,
    )(x, w, b.reshape(1, N))


def pallas_attention_outproj_fusedqkv(qkv, wo, bo, heads, head_dim):
    """qkv: (B, S, 3D) projected slab -> attention + output projection."""
    B, S, threeD = qkv.shape
    D = heads * head_dim
    assert threeD == 3 * D
    kernel = functools.partial(_attn_outproj_kernel_fusedqkv,
                               heads=heads, head_dim=head_dim)
    cost = _attn_cost(B, S, heads, head_dim, proj_flops=0,
                      in_elems=B * S * threeD + D * D + D,
                      out_elems=B * S * D)
    return pl.pallas_call(
        kernel,
        out_shape=jax.ShapeDtypeStruct((B, S, D), qkv.dtype),
        grid=(B,),
        in_specs=[
            pl.BlockSpec((None, S, threeD), lambda b: (b, 0, 0)),
            pl.BlockSpec((D, D), lambda b: (0, 0)),
            pl.BlockSpec((1, D), lambda b: (0, 0)),
        ],
        out_specs=pl.BlockSpec((None, S, D), lambda b: (b, 0, 0)),
        compiler_params=pltpu.CompilerParams(dimension_semantics=("parallel",)),
        cost_estimate=cost,
    )(qkv, wo, bo.reshape(1, D))


def pallas_attention_outproj_split(Q, K, V, wo, bo, heads, head_dim):
    """Q/K/V: (B, S, D) each -> attention + output projection."""
    B, S, D = Q.shape
    kernel = functools.partial(_attn_outproj_kernel_split,
                               heads=heads, head_dim=head_dim)
    act_spec = pl.BlockSpec((None, S, D), lambda b: (b, 0, 0))
    cost = _attn_cost(B, S, heads, head_dim, proj_flops=0,
                      in_elems=3 * B * S * D + D * D + D,
                      out_elems=B * S * D)
    return pl.pallas_call(
        kernel,
        out_shape=jax.ShapeDtypeStruct((B, S, D), Q.dtype),
        grid=(B,),
        in_specs=[act_spec, act_spec, act_spec,
                  pl.BlockSpec((D, D), lambda b: (0, 0)),
                  pl.BlockSpec((1, D), lambda b: (0, 0))],
        out_specs=act_spec,
        compiler_params=pltpu.CompilerParams(dimension_semantics=("parallel",)),
        cost_estimate=cost,
    )(Q, K, V, wo, bo.reshape(1, D))


# ------------------------------ module wrapper --------------------------------

class MultiHeadAttentionPallas:
    """JAX/Pallas port of the PyTorch MultiHeadAttention (eval mode)."""

    def __init__(self, dim, heads, key, dtype=jnp.float32):
        assert dim % heads == 0
        self.dim = dim
        self.heads = heads
        self.head_dim = dim // heads
        keys = jax.random.split(key, 8)
        bound = 1.0 / math.sqrt(dim)

        def init_linear(kw, kb):
            # nn.Linear stores weight as (out, in); we keep (in, out) so the
            # forward is x @ W + b  (== x @ weight.T + b).
            w = jax.random.uniform(kw, (dim, dim), dtype, -bound, bound)
            b = jax.random.uniform(kb, (dim,), dtype, -bound, bound)
            return w, b

        self.wq, self.bq = init_linear(keys[0], keys[1])
        self.wk, self.bk = init_linear(keys[2], keys[3])
        self.wv, self.bv = init_linear(keys[4], keys[5])
        self.wo, self.bo = init_linear(keys[6], keys[7])

        # Fused (D, 3D) projection weight for the self-attention fast path.
        self.w_qkv = jnp.concatenate([self.wq, self.wk, self.wv], axis=1)
        self.b_qkv = jnp.concatenate([self.bq, self.bk, self.bv], axis=0)

    def __call__(self, q, k, v, mask=None, *, force_unfused=False):
        if mask is not None:
            # TODO(synk): masked_fill(-1e9) path not implemented.
            raise NotImplementedError("mask support not implemented")

        B, S, D = q.shape
        H, Dh = self.heads, self.head_dim
        self_attn = (q is k) and (k is v)
        n_streams = 1 if self_attn else 3
        use_fused = (not force_unfused) and _fused_fits_vmem(S, D, n_streams)

        if self_attn:
            if use_fused:
                return pallas_mha_self_fused(q, self.w_qkv, self.b_qkv,
                                             self.wo, self.bo, H, Dh)
            # Fallback: tiled fused-QKV projection, then attention + out-proj.
            qkv = pallas_linear(q.reshape(B * S, D), self.w_qkv, self.b_qkv)
            return pallas_attention_outproj_fusedqkv(qkv.reshape(B, S, 3 * D),
                                                     self.wo, self.bo, H, Dh)

        if use_fused:
            return pallas_mha_cross_fused(q, k, v,
                                          self.wq, self.bq, self.wk, self.bk,
                                          self.wv, self.bv, self.wo, self.bo, H, Dh)
        # Fallback: three tiled projections, then attention + out-proj.
        Q = pallas_linear(q.reshape(B * S, D), self.wq, self.bq).reshape(B, S, D)
        K = pallas_linear(k.reshape(B * S, D), self.wk, self.bk).reshape(B, S, D)
        V = pallas_linear(v.reshape(B * S, D), self.wv, self.bv).reshape(B, S, D)
        return pallas_attention_outproj_split(Q, K, V, self.wo, self.bo, H, Dh)


# --------------------------- reference (pure JAX) ----------------------------

def reference_forward(mha, q, k, v):
    B, S, D = q.shape
    H, Dh = mha.heads, mha.head_dim
    Q = q.reshape(B * S, D) @ mha.wq + mha.bq
    K = k.reshape(B * S, D) @ mha.wk + mha.bk
    V = v.reshape(B * S, D) @ mha.wv + mha.bv
    Qh = Q.reshape(B, S, H, Dh).transpose(0, 2, 1, 3)
    Kh = K.reshape(B, S, H, Dh).transpose(0, 2, 1, 3)
    Vh = V.reshape(B, S, H, Dh).transpose(0, 2, 1, 3)
    scores = jnp.einsum("bhqd,bhkd->bhqk", Qh, Kh) / math.sqrt(Dh)
    p = jax.nn.softmax(scores, axis=-1)
    attn = jnp.einsum("bhqk,bhkd->bhqd", p, Vh)
    attn = attn.transpose(0, 2, 1, 3).reshape(B, S, D)
    return (attn.reshape(B * S, D) @ mha.wo + mha.bo).reshape(B, S, D)


if __name__ == "__main__":
    B, S, D, H = 2, 8, 32, 4

    root = jax.random.PRNGKey(0)
    kparam, kq, kk, kv, kx = jax.random.split(root, 5)

    mha = MultiHeadAttentionPallas(D, H, kparam)

    # Cross-attention (distinct q, k, v): fused path + fallback path.
    q = jax.random.normal(kq, (B, S, D), jnp.float32)
    k = jax.random.normal(kk, (B, S, D), jnp.float32)
    v = jax.random.normal(kv, (B, S, D), jnp.float32)
    ref_x = jax.block_until_ready(reference_forward(mha, q, k, v))
    out_x_fused = jax.block_until_ready(mha(q, k, v))
    out_x_tiled = jax.block_until_ready(mha(q, k, v, force_unfused=True))

    # Self-attention (same tensor for q/k/v): fused path + fallback path.
    x = jax.random.normal(kx, (B, S, D), jnp.float32)
    ref_sa = jax.block_until_ready(reference_forward(mha, x, x, x))
    out_sa_fused = jax.block_until_ready(mha(x, x, x))
    out_sa_tiled = jax.block_until_ready(mha(x, x, x, force_unfused=True))

    for out, ref, name in [
        (out_x_fused, ref_x, "cross-attn fused"),
        (out_x_tiled, ref_x, "cross-attn tiled"),
        (out_sa_fused, ref_sa, "self-attn fused"),
        (out_sa_tiled, ref_sa, "self-attn tiled"),
    ]:
        assert out.shape == (B, S, D), name
        assert jnp.allclose(out, ref, atol=2e-3, rtol=2e-3), f"{name} mismatch"

    print("KERNEL_OK")
</pallas_src>

<mosaic_0001>
module attributes {stable_mosaic.version = 11 : i64} {
  func.func @_fused_mha_cross_kernel(%arg0: i32, %arg1: memref<1x8x32xf32, #tpu.memory_space<vmem>>, %arg2: memref<1x8x32xf32, #tpu.memory_space<vmem>>, %arg3: memref<1x8x32xf32, #tpu.memory_space<vmem>>, %arg4: memref<32x32xf32, #tpu.memory_space<vmem>>, %arg5: memref<1x32xf32, #tpu.memory_space<vmem>>, %arg6: memref<32x32xf32, #tpu.memory_space<vmem>>, %arg7: memref<1x32xf32, #tpu.memory_space<vmem>>, %arg8: memref<32x32xf32, #tpu.memory_space<vmem>>, %arg9: memref<1x32xf32, #tpu.memory_space<vmem>>, %arg10: memref<32x32xf32, #tpu.memory_space<vmem>>, %arg11: memref<1x32xf32, #tpu.memory_space<vmem>>, %arg12: memref<1x8x32xf32, #tpu.memory_space<vmem>>) attributes {dimension_semantics = [#tpu.dimension_semantics<parallel>], iteration_bounds = array<i64: 2>, scalar_prefetch = 0 : i64, scratch_operands = 0 : i64, tpu.core_type = #tpu.core_type<tc>, window_params = [{transform_indices = @transform_0, window_bounds = array<i64: 1, 8, 32>}, {transform_indices = @transform_1, window_bounds = array<i64: 1, 8, 32>}, {transform_indices = @transform_2, window_bounds = array<i64: 1, 8, 32>}, {pipeline_mode = #tpu.pipeline_mode<synchronous>, transform_indices = @transform_3, window_bounds = array<i64: 32, 32>}, {pipeline_mode = #tpu.pipeline_mode<synchronous>, transform_indices = @transform_4, window_bounds = array<i64: 1, 32>}, {pipeline_mode = #tpu.pipeline_mode<synchronous>, transform_indices = @transform_5, window_bounds = array<i64: 32, 32>}, {pipeline_mode = #tpu.pipeline_mode<synchronous>, transform_indices = @transform_6, window_bounds = array<i64: 1, 32>}, {pipeline_mode = #tpu.pipeline_mode<synchronous>, transform_indices = @transform_7, window_bounds = array<i64: 32, 32>}, {pipeline_mode = #tpu.pipeline_mode<synchronous>, transform_indices = @transform_8, window_bounds = array<i64: 1, 32>}, {pipeline_mode = #tpu.pipeline_mode<synchronous>, transform_indices = @transform_9, window_bounds = array<i64: 32, 32>}, {pipeline_mode = #tpu.pipeline_mode<synchronous>, transform_indices = @transform_10, window_bounds = array<i64: 1, 32>}, {transform_indices = @transform_11, window_bounds = array<i64: 1, 8, 32>}]} {
    %c0 = arith.constant 0 : index
    %c0_0 = arith.constant 0 : index
    %c0_1 = arith.constant 0 : index
    %0 = vector.load %arg1[%c0, %c0_0, %c0_1] : memref<1x8x32xf32, #tpu.memory_space<vmem>>, vector<1x8x32xf32>
    %1 = vector.shape_cast %0 : vector<1x8x32xf32> to vector<8x32xf32>
    %c0_2 = arith.constant 0 : index
    %c0_3 = arith.constant 0 : index
    %2 = vector.load %arg4[%c0_2, %c0_3] : memref<32x32xf32, #tpu.memory_space<vmem>>, vector<32x32xf32>
    %cst = arith.constant dense<0.000000e+00> : vector<8x32xf32>
    %3 = tpu.matmul %1, %2, %cst {dimension_numbers = #tpu.dot_dimension_numbers<[1], [0], [0], [1], [0, 0, 1, 1], [], []>, precision = #tpu.contract_precision<fp32>} : vector<8x32xf32>, vector<32x32xf32>, vector<8x32xf32> -> vector<8x32xf32>
    %c0_4 = arith.constant 0 : index
    %c0_5 = arith.constant 0 : index
    %4 = vector.load %arg5[%c0_4, %c0_5] : memref<1x32xf32, #tpu.memory_space<vmem>>, vector<1x32xf32>
    %5 = vector.broadcast %4 : vector<1x32xf32> to vector<8x32xf32>
    %6 = arith.addf %3, %5 : vector<8x32xf32>
    %c0_6 = arith.constant 0 : index
    %c0_7 = arith.constant 0 : index
    %c0_8 = arith.constant 0 : index
    %7 = vector.load %arg2[%c0_6, %c0_7, %c0_8] : memref<1x8x32xf32, #tpu.memory_space<vmem>>, vector<1x8x32xf32>
    %8 = vector.shape_cast %7 : vector<1x8x32xf32> to vector<8x32xf32>
    %c0_9 = arith.constant 0 : index
    %c0_10 = arith.constant 0 : index
    %9 = vector.load %arg6[%c0_9, %c0_10] : memref<32x32xf32, #tpu.memory_space<vmem>>, vector<32x32xf32>
    %cst_11 = arith.constant dense<0.000000e+00> : vector<8x32xf32>
    %10 = tpu.matmul %8, %9, %cst_11 {dimension_numbers = #tpu.dot_dimension_numbers<[1], [0], [0], [1], [0, 0, 1, 1], [], []>, precision = #tpu.contract_precision<fp32>} : vector<8x32xf32>, vector<32x32xf32>, vector<8x32xf32> -> vector<8x32xf32>
    %c0_12 = arith.constant 0 : index
    %c0_13 = arith.constant 0 : index
    %11 = vector.load %arg7[%c0_12, %c0_13] : memref<1x32xf32, #tpu.memory_space<vmem>>, vector<1x32xf32>
    %12 = vector.broadcast %11 : vector<1x32xf32> to vector<8x32xf32>
    %13 = arith.addf %10, %12 : vector<8x32xf32>
    %c0_14 = arith.constant 0 : index
    %c0_15 = arith.constant 0 : index
    %c0_16 = arith.constant 0 : index
    %14 = vector.load %arg3[%c0_14, %c0_15, %c0_16] : memref<1x8x32xf32, #tpu.memory_space<vmem>>, vector<1x8x32xf32>
    %15 = vector.shape_cast %14 : vector<1x8x32xf32> to vector<8x32xf32>
    %c0_17 = arith.constant 0 : index
    %c0_18 = arith.constant 0 : index
    %16 = vector.load %arg8[%c0_17, %c0_18] : memref<32x32xf32, #tpu.memory_space<vmem>>, vector<32x32xf32>
    %cst_19 = arith.constant dense<0.000000e+00> : vector<8x32xf32>
    %17 = tpu.matmul %15, %16, %cst_19 {dimension_numbers = #tpu.dot_dimension_numbers<[1], [0], [0], [1], [0, 0, 1, 1], [], []>, precision = #tpu.contract_precision<fp32>} : vector<8x32xf32>, vector<32x32xf32>, vector<8x32xf32> -> vector<8x32xf32>
    %c0_20 = arith.constant 0 : index
    %c0_21 = arith.constant 0 : index
    %18 = vector.load %arg9[%c0_20, %c0_21] : memref<1x32xf32, #tpu.memory_space<vmem>>, vector<1x32xf32>
    %19 = vector.broadcast %18 : vector<1x32xf32> to vector<8x32xf32>
    %20 = arith.addf %17, %19 : vector<8x32xf32>
    %21 = vector.extract_strided_slice %6 {offsets = [0, 0], sizes = [8, 8], strides = [1, 1]} : vector<8x32xf32> to vector<8x8xf32>
    %cst_22 = arith.constant 0.353553385 : f32
    %22 = vector.broadcast %cst_22 : f32 to vector<8x8xf32>
    %23 = arith.mulf %21, %22 : vector<8x8xf32>
    %24 = vector.extract_strided_slice %13 {offsets = [0, 0], sizes = [8, 8], strides = [1, 1]} : vector<8x32xf32> to vector<8x8xf32>
    %25 = vector.extract_strided_slice %20 {offsets = [0, 0], sizes = [8, 8], strides = [1, 1]} : vector<8x32xf32> to vector<8x8xf32>
    %cst_23 = arith.constant dense<0.000000e+00> : vector<8x8xf32>
    %26 = tpu.matmul %23, %24, %cst_23 {dimension_numbers = #tpu.dot_dimension_numbers<[1], [1], [0], [0], [0, 0, 1, 0], [], []>, precision = #tpu.contract_precision<fp32>} : vector<8x8xf32>, vector<8x8xf32>, vector<8x8xf32> -> vector<8x8xf32>
    %cst_24 = arith.constant dense<0xFF800000> : vector<8xf32>
    %27 = vector.multi_reduction <maximumf>, %26, %cst_24 [1] : vector<8x8xf32> to vector<8xf32>
    %28 = vector.shape_cast %27 : vector<8xf32> to vector<8x1xf32>
    %29 = vector.broadcast %28 : vector<8x1xf32> to vector<8x8xf32>
    %30 = arith.subf %26, %29 : vector<8x8xf32>
    %31 = math.exp %30 : vector<8x8xf32>
    %cst_25 = arith.constant dense<0.000000e+00> : vector<8xf32>
    %32 = vector.multi_reduction <add>, %31, %cst_25 [1] : vector<8x8xf32> to vector<8xf32>
    %33 = vector.shape_cast %32 : vector<8xf32> to vector<8x1xf32>
    %34 = tpu.reciprocal %33 {approx = true} : vector<8x1xf32> -> vector<8x1xf32>
    %35 = vector.broadcast %34 : vector<8x1xf32> to vector<8x8xf32>
    %36 = arith.mulf %31, %35 : vector<8x8xf32>
    %cst_26 = arith.constant dense<0.000000e+00> : vector<8x8xf32>
    %37 = tpu.matmul %36, %25, %cst_26 {dimension_numbers = #tpu.dot_dimension_numbers<[1], [0], [0], [1], [0, 0, 1, 1], [], []>, precision = #tpu.contract_precision<fp32>} : vector<8x8xf32>, vector<8x8xf32>, vector<8x8xf32> -> vector<8x8xf32>
    %38 = vector.extract_strided_slice %6 {offsets = [0, 8], sizes = [8, 8], strides = [1, 1]} : vector<8x32xf32> to vector<8x8xf32>
    %cst_27 = arith.constant 0.353553385 : f32
    %39 = vector.broadcast %cst_27 : f32 to vector<8x8xf32>
    %40 = arith.mulf %38, %39 : vector<8x8xf32>
    %41 = vector.extract_strided_slice %13 {offsets = [0, 8], sizes = [8, 8], strides = [1, 1]} : vector<8x32xf32> to vector<8x8xf32>
    %42 = vector.extract_strided_slice %20 {offsets = [0, 8], sizes = [8, 8], strides = [1, 1]} : vector<8x32xf32> to vector<8x8xf32>
    %cst_28 = arith.constant dense<0.000000e+00> : vector<8x8xf32>
    %43 = tpu.matmul %40, %41, %cst_28 {dimension_numbers = #tpu.dot_dimension_numbers<[1], [1], [0], [0], [0, 0, 1, 0], [], []>, precision = #tpu.contract_precision<fp32>} : vector<8x8xf32>, vector<8x8xf32>, vector<8x8xf32> -> vector<8x8xf32>
    %cst_29 = arith.constant dense<0xFF800000> : vector<8xf32>
    %44 = vector.multi_reduction <maximumf>, %43, %cst_29 [1] : vector<8x8xf32> to vector<8xf32>
    %45 = vector.shape_cast %44 : vector<8xf32> to vector<8x1xf32>
    %46 = vector.broadcast %45 : vector<8x1xf32> to vector<8x8xf32>
    %47 = arith.subf %43, %46 : vector<8x8xf32>
    %48 = math.exp %47 : vector<8x8xf32>
    %cst_30 = arith.constant dense<0.000000e+00> : vector<8xf32>
    %49 = vector.multi_reduction <add>, %48, %cst_30 [1] : vector<8x8xf32> to vector<8xf32>
    %50 = vector.shape_cast %49 : vector<8xf32> to vector<8x1xf32>
    %51 = tpu.reciprocal %50 {approx = true} : vector<8x1xf32> -> vector<8x1xf32>
    %52 = vector.broadcast %51 : vector<8x1xf32> to vector<8x8xf32>
    %53 = arith.mulf %48, %52 : vector<8x8xf32>
    %cst_31 = arith.constant dense<0.000000e+00> : vector<8x8xf32>
    %54 = tpu.matmul %53, %42, %cst_31 {dimension_numbers = #tpu.dot_dimension_numbers<[1], [0], [0], [1], [0, 0, 1, 1], [], []>, precision = #tpu.contract_precision<fp32>} : vector<8x8xf32>, vector<8x8xf32>, vector<8x8xf32> -> vector<8x8xf32>
    %55 = vector.extract_strided_slice %6 {offsets = [0, 16], sizes = [8, 8], strides = [1, 1]} : vector<8x32xf32> to vector<8x8xf32>
    %cst_32 = arith.constant 0.353553385 : f32
    %56 = vector.broadcast %cst_32 : f32 to vector<8x8xf32>
    %57 = arith.mulf %55, %56 : vector<8x8xf32>
    %58 = vector.extract_strided_slice %13 {offsets = [0, 16], sizes = [8, 8], strides = [1, 1]} : vector<8x32xf32> to vector<8x8xf32>
    %59 = vector.extract_strided_slice %20 {offsets = [0, 16], sizes = [8, 8], strides = [1, 1]} : vector<8x32xf32> to vector<8x8xf32>
    %cst_33 = arith.constant dense<0.000000e+00> : vector<8x8xf32>
    %60 = tpu.matmul %57, %58, %cst_33 {dimension_numbers = #tpu.dot_dimension_numbers<[1], [1], [0], [0], [0, 0, 1, 0], [], []>, precision = #tpu.contract_precision<fp32>} : vector<8x8xf32>, vector<8x8xf32>, vector<8x8xf32> -> vector<8x8xf32>
    %cst_34 = arith.constant dense<0xFF800000> : vector<8xf32>
    %61 = vector.multi_reduction <maximumf>, %60, %cst_34 [1] : vector<8x8xf32> to vector<8xf32>
    %62 = vector.shape_cast %61 : vector<8xf32> to vector<8x1xf32>
    %63 = vector.broadcast %62 : vector<8x1xf32> to vector<8x8xf32>
    %64 = arith.subf %60, %63 : vector<8x8xf32>
    %65 = math.exp %64 : vector<8x8xf32>
    %cst_35 = arith.constant dense<0.000000e+00> : vector<8xf32>
    %66 = vector.multi_reduction <add>, %65, %cst_35 [1] : vector<8x8xf32> to vector<8xf32>
    %67 = vector.shape_cast %66 : vector<8xf32> to vector<8x1xf32>
    %68 = tpu.reciprocal %67 {approx = true} : vector<8x1xf32> -> vector<8x1xf32>
    %69 = vector.broadcast %68 : vector<8x1xf32> to vector<8x8xf32>
    %70 = arith.mulf %65, %69 : vector<8x8xf32>
    %cst_36 = arith.constant dense<0.000000e+00> : vector<8x8xf32>
    %71 = tpu.matmul %70, %59, %cst_36 {dimension_numbers = #tpu.dot_dimension_numbers<[1], [0], [0], [1], [0, 0, 1, 1], [], []>, precision = #tpu.contract_precision<fp32>} : vector<8x8xf32>, vector<8x8xf32>, vector<8x8xf32> -> vector<8x8xf32>
    %72 = vector.extract_strided_slice %6 {offsets = [0, 24], sizes = [8, 8], strides = [1, 1]} : vector<8x32xf32> to vector<8x8xf32>
    %cst_37 = arith.constant 0.353553385 : f32
    %73 = vector.broadcast %cst_37 : f32 to vector<8x8xf32>
    %74 = arith.mulf %72, %73 : vector<8x8xf32>
    %75 = vector.extract_strided_slice %13 {offsets = [0, 24], sizes = [8, 8], strides = [1, 1]} : vector<8x32xf32> to vector<8x8xf32>
    %76 = vector.extract_strided_slice %20 {offsets = [0, 24], sizes = [8, 8], strides = [1, 1]} : vector<8x32xf32> to vector<8x8xf32>
    %cst_38 = arith.constant dense<0.000000e+00> : vector<8x8xf32>
    %77 = tpu.matmul %74, %75, %cst_38 {dimension_numbers = #tpu.dot_dimension_numbers<[1], [1], [0], [0], [0, 0, 1, 0], [], []>, precision = #tpu.contract_precision<fp32>} : vector<8x8xf32>, vector<8x8xf32>, vector<8x8xf32> -> vector<8x8xf32>
    %cst_39 = arith.constant dense<0xFF800000> : vector<8xf32>
    %78 = vector.multi_reduction <maximumf>, %77, %cst_39 [1] : vector<8x8xf32> to vector<8xf32>
    %79 = vector.shape_cast %78 : vector<8xf32> to vector<8x1xf32>
    %80 = vector.broadcast %79 : vector<8x1xf32> to vector<8x8xf32>
    %81 = arith.subf %77, %80 : vector<8x8xf32>
    %82 = math.exp %81 : vector<8x8xf32>
    %cst_40 = arith.constant dense<0.000000e+00> : vector<8xf32>
    %83 = vector.multi_reduction <add>, %82, %cst_40 [1] : vector<8x8xf32> to vector<8xf32>
    %84 = vector.shape_cast %83 : vector<8xf32> to vector<8x1xf32>
    %85 = tpu.reciprocal %84 {approx = true} : vector<8x1xf32> -> vector<8x1xf32>
    %86 = vector.broadcast %85 : vector<8x1xf32> to vector<8x8xf32>
    %87 = arith.mulf %82, %86 : vector<8x8xf32>
    %cst_41 = arith.constant dense<0.000000e+00> : vector<8x8xf32>
    %88 = tpu.matmul %87, %76, %cst_41 {dimension_numbers = #tpu.dot_dimension_numbers<[1], [0], [0], [1], [0, 0, 1, 1], [], []>, precision = #tpu.contract_precision<fp32>} : vector<8x8xf32>, vector<8x8xf32>, vector<8x8xf32> -> vector<8x8xf32>
    %89 = tpu.concatenate %37, %54, %71, %88 in 1 : vector<8x8xf32>, vector<8x8xf32>, vector<8x8xf32>, vector<8x8xf32> -> vector<8x32xf32>
    %c0_42 = arith.constant 0 : index
    %c0_43 = arith.constant 0 : index
    %90 = vector.load %arg10[%c0_42, %c0_43] : memref<32x32xf32, #tpu.memory_space<vmem>>, vector<32x32xf32>
    %cst_44 = arith.constant dense<0.000000e+00> : vector<8x32xf32>
    %91 = tpu.matmul %89, %90, %cst_44 {dimension_numbers = #tpu.dot_dimension_numbers<[1], [0], [0], [1], [0, 0, 1, 1], [], []>, precision = #tpu.contract_precision<fp32>} : vector<8x32xf32>, vector<32x32xf32>, vector<8x32xf32> -> vector<8x32xf32>
    %c0_45 = arith.constant 0 : index
    %c0_46 = arith.constant 0 : index
    %92 = vector.load %arg11[%c0_45, %c0_46] : memref<1x32xf32, #tpu.memory_space<vmem>>, vector<1x32xf32>
    %93 = vector.broadcast %92 : vector<1x32xf32> to vector<8x32xf32>
    %94 = arith.addf %91, %93 : vector<8x32xf32>
    %c0_47 = arith.constant 0 : index
    %c0_48 = arith.constant 0 : index
    %c0_49 = arith.constant 0 : index
    %95 = vector.load %arg12[%c0_47, %c0_48, %c0_49] : memref<1x8x32xf32, #tpu.memory_space<vmem>>, vector<1x8x32xf32>
    %96 = vector.shape_cast %95 : vector<1x8x32xf32> to vector<8x32xf32>
    %97 = vector.shape_cast %94 : vector<8x32xf32> to vector<1x8x32xf32>
    tpu.vector_store %arg12[%c0_47, %c0_48, %c0_49], %97 {strides = array<i32>} : memref<1x8x32xf32, #tpu.memory_space<vmem>>, vector<1x8x32xf32>,
    return
  }
  func.func @transform_0(%arg0: i32) -> (i32, i32, i32) {
    %c0_i32 = arith.constant 0 : i32
    %c0_i32_0 = arith.constant 0 : i32
    %c0_i32_1 = arith.constant 0 : i32
    return %arg0, %c0_i32, %c0_i32_0 : i32, i32, i32
  }
  func.func @transform_1(%arg0: i32) -> (i32, i32, i32) {
    %c0_i32 = arith.constant 0 : i32
    %c0_i32_0 = arith.constant 0 : i32
    %c0_i32_1 = arith.constant 0 : i32
    return %arg0, %c0_i32, %c0_i32_0 : i32, i32, i32
  }
  func.func @transform_2(%arg0: i32) -> (i32, i32, i32) {
    %c0_i32 = arith.constant 0 : i32
    %c0_i32_0 = arith.constant 0 : i32
    %c0_i32_1 = arith.constant 0 : i32
    return %arg0, %c0_i32, %c0_i32_0 : i32, i32, i32
  }
  func.func @transform_3(%arg0: i32) -> (i32, i32) {
    %c0_i32 = arith.constant 0 : i32
    %c0_i32_0 = arith.constant 0 : i32
    %c0_i32_1 = arith.constant 0 : i32
    return %c0_i32, %c0_i32_0 : i32, i32
  }
  func.func @transform_4(%arg0: i32) -> (i32, i32) {
    %c0_i32 = arith.constant 0 : i32
    %c0_i32_0 = arith.constant 0 : i32
    %c0_i32_1 = arith.constant 0 : i32
    return %c0_i32, %c0_i32_0 : i32, i32
  }
  func.func @transform_5(%arg0: i32) -> (i32, i32) {
    %c0_i32 = arith.constant 0 : i32
    %c0_i32_0 = arith.constant 0 : i32
    %c0_i32_1 = arith.constant 0 : i32
    return %c0_i32, %c0_i32_0 : i32, i32
  }
  func.func @transform_6(%arg0: i32) -> (i32, i32) {
    %c0_i32 = arith.constant 0 : i32
    %c0_i32_0 = arith.constant 0 : i32
    %c0_i32_1 = arith.constant 0 : i32
    return %c0_i32, %c0_i32_0 : i32, i32
  }
  func.func @transform_7(%arg0: i32) -> (i32, i32) {
    %c0_i32 = arith.constant 0 : i32
    %c0_i32_0 = arith.constant 0 : i32
    %c0_i32_1 = arith.constant 0 : i32
    return %c0_i32, %c0_i32_0 : i32, i32
  }
  func.func @transform_8(%arg0: i32) -> (i32, i32) {
    %c0_i32 = arith.constant 0 : i32
    %c0_i32_0 = arith.constant 0 : i32
    %c0_i32_1 = arith.constant 0 : i32
    return %c0_i32, %c0_i32_0 : i32, i32
  }
  func.func @transform_9(%arg0: i32) -> (i32, i32) {
    %c0_i32 = arith.constant 0 : i32
    %c0_i32_0 = arith.constant 0 : i32
    %c0_i32_1 = arith.constant 0 : i32
    return %c0_i32, %c0_i32_0 : i32, i32
  }
  func.func @transform_10(%arg0: i32) -> (i32, i32) {
    %c0_i32 = arith.constant 0 : i32
    %c0_i32_0 = arith.constant 0 : i32
    %c0_i32_1 = arith.constant 0 : i32
    return %c0_i32, %c0_i32_0 : i32, i32
  }
  func.func @transform_11(%arg0: i32) -> (i32, i32, i32) {
    %c0_i32 = arith.constant 0 : i32
    %c0_i32_0 = arith.constant 0 : i32
    %c0_i32_1 = arith.constant 0 : i32
    return %arg0, %c0_i32, %c0_i32_0 : i32, i32, i32
  }
}

</mosaic_0001>

<bundles_post_ra>
// kernel: tpu_custom_call.1
= control target key start
LH: loop header
LB: loop body
LE: loop exit
PB: predicated region body
PF: predicated region fallthrough
CT: control target
= control target key end

     0   :  { %s8961_s0 = inlined_call_operand.hbm [shape: f32[2,8,32], index: 0, kind: input, shape index: {}]   ;;  %s8962_s1 = inlined_call_operand.hbm [shape: f32[2,8,32], index: 1, kind: input, shape index: {}]   ;;  %s8963_s2 = inlined_call_operand.hbm [shape: f32[2,8,32], index: 2, kind: input, shape index: {}]   ;;  %s8964_s3 = inlined_call_operand.hbm [shape: f32[32,32], index: 3, kind: input, shape index: {}]   ;;  %s8965_s4 = inlined_call_operand.hbm [shape: f32[1,32], index: 4, kind: input, shape index: {}]   ;;  %s8966_s5 = inlined_call_operand.hbm [shape: f32[32,32], index: 5, kind: input, shape index: {}]   ;;  %s8967_s6 = inlined_call_operand.hbm [shape: f32[1,32], index: 6, kind: input, shape index: {}]   ;;  %s8968_s7 = inlined_call_operand.hbm [shape: f32[32,32], index: 7, kind: input, shape index: {}]   ;;  %s8969_s8 = inlined_call_operand.hbm [shape: f32[1,32], index: 8, kind: input, shape index: {}]   ;;  %s8970_s9 = inlined_call_operand.hbm [shape: f32[32,32], index: 9, kind: input, shape index: {}]   ;;  %s8971_s10 = inlined_call_operand.hbm [shape: f32[1,32], index: 10, kind: input, shape index: {}]   ;;  %s8972_s11 = inlined_call_operand.hbm [shape: f32[2,8,32], index: 11, kind: output, shape index: {}]  }
   0x1   :  { %8993 = sst [smem:[#allocation33_spill]] %s8962_s1 }
   0x2   :  { %8994 = sst [smem:[#allocation34_spill]] %s8963_s2 }
   0x3   :  { %8995 = sst [smem:[#allocation35_spill]] %s8964_s3 }
   0x4   :  { %8996 = sst [smem:[#allocation36_spill]] %s8966_s5 }
   0x5   :  { %8997 = sst [smem:[#allocation37_spill]] %s8968_s7 }
   0x6   :  { %8998 = sst [smem:[#allocation38_spill]] %s8970_s9 }
   0x7   :  { %8999 = sst [smem:[#allocation39_spill]] %s8972_s11 }
   0x8   :  { %16 = vsyncpa [#allocation3], 0 }
   0x9   :  { %18 = vsyncpa [#allocation3 + $0x1], 0 }
   0xa   :  { %19 = vsyncpa [#allocation6], 0 }
   0xb   :  { %21 = vsyncpa [#allocation6 + $0x1], 0 }
   0xc   :  { %22 = vsyncpa [#allocation9], 0 }
   0xd   :  { %23 = vsyncpa [#allocation12], 0 }
   0xe   :  { %24 = vsyncpa [#allocation15], 0 }
   0xf   :  { %25 = vsyncpa [#allocation18], 0 }
  0x10   :  { %26 = vsyncpa [#allocation4], 0 }
  0x11   :  { %28 = vsyncpa [#allocation4 + $0x1], 0  ;;  %s8142_s17 = smov 0   ;;  %s8144_s18 = smov 0  }
  0x12   :  { %s8146_s19 = smov 0   ;;  %s8148_s20 = smov 0  }
  0x13 LB: > { %9000 = sst [smem:[#allocation28_spill]] %s8057_s20  ;;  %s8059_s21 = smov [#allocation8]   ;;  %s8057_s20 = sphi %s8148_s20, %s9043_s20   ;;  %s8053_s19 = sphi %s8146_s19, %s9047_s19   ;;  %s8049_s18 = sphi %s8144_s18, %s9046_s18   ;;  %s8045_s17 = sphi %s8142_s17, %s9045_s17  }
  0x14   : > { %s323_s22 = sshll.u32 %s8059_s21, 4  ;;  %s8163_s23 = sadd.s32 4294967295, %s8057_s20   ;;  %s8168_s22 = int_to_ptr.vmem [resolvable:$true] %s323_s22 }
  0x15   : > { %p6469_p0 = scmp.ge.s32.totalorder %s8057_s20, 1  ;;  %p8976_p1 = scmp.eq.s32.totalorder %s8163_s23, 0 }
  0x16   : > { %p311_p2 = scmp.lt.s32.totalorder %s8057_s20, 3  ;;  %s8060_s25 = smov [#allocation11]  }
  0x17   : > { %s347_s26 = sshll.u32 %s8060_s25, 4  ;;  %s8061_s28 = smov [#allocation14]   ;;  %s8183_s26 = int_to_ptr.vmem [resolvable:$true] %s347_s26 }
  0x18   : > { %p8170_p3 = pnand %p6469_p0, %p311_p2  ;;  %s371_s29 = sshll.u32 %s8061_s28, 4  ;;  %s8185_s29 = int_to_ptr.vmem [resolvable:$true] %s371_s29 }
  0x19   : > { %s9004_s3 = sld [smem:[#allocation35_spill]] }
  0x1a   : > { %s9001_s24 = scalar_select %p8170_p3, 1, 0 }
  0x1b   : > { %p7533_p5 = pneg %p8170_p3 }
  0x1c   : > { %9002 = sst [smem:[#allocation29_spill]] %s9001_s24 }
  0x1d   : > { %p8179_p6 = pnand %p7533_p5, %p8976_p1 }
  0x1f   : > { %s9003_s27 = scalar_select %p8179_p6, 1, 0 }
  0x20   : > { %s7657_s13 = scalar_lea.hbm %s9004_s3, 512  ;;  %p8195_p8 = pneg %p8179_p6 }
  0x21   : > { %p7658_p7 = scmp.ne.s32.totalorder %s9004_s3, %s7657_s13  ;;  %p7664_p11 = scmp.lt.u32.totalorder %s7657_s13, %s9004_s3 }
  0x22   : > { %s9005_s16 = scalar_select %p8195_p8, 1, 0 }
  0x23   : > { %p7660_p9 = pnand %p8195_p8, %p7658_p7 }
  0x25   : > { %p7661_p10 = pneg %p7660_p9 }
  0x27   : > { %p7666_p12 = pnand %p7664_p11, %p7661_p10 }
  0x29   : > { %7669 = shalt.err (!%p7666_p12)
}
  0x2a   : > { %s7670_s28 = scalar_lea.vmem %s8168_s22, 512  ;;  %p7678_p5 = scmp.lt.s32.totalorder %s8168_s22, %s8168_s22 }
  0x2b   : > { %p7671_p13 = scmp.ne.s32.totalorder %s8168_s22, %s7670_s28  ;;  %p7679_p4 = scmp.lt.s32.totalorder %s7670_s28, %s7670_s28 }
  0x2d   : > { %p7673_p0 = pnand %p7671_p13, %p8195_p8  ;;  %p7680_p7 = por %p7679_p4, %p7678_p5 }
  0x2f   : > { %p7674_p2 = pneg %p7673_p0 }
  0x31   : > { %p7681_p9 = pnand %p7680_p7, %p7674_p2 }
  0x33   : > { %7684 = shalt.err (!%p7681_p9)
}
  0x34   : > { %s8062_s30 = smov 128   ;;  %s8063_s12 = smov 8  }
  0x35   : > { %7536 = dma.hbm_to_vmem [thread:$0]  (!%p8179_p6), %s9004_s3, 512, %s8168_s22, [#allocation9], %s8062_s30, %s8062_s30, %s8063_s12  }
  0x36   : > { %s9006_s5 = sld [smem:[#allocation36_spill]] }
  0x3c   : > { %s7685_s25 = scalar_lea.hbm %s9006_s5, 512 }
  0x3d   : > { %p7686_p4 = scmp.ne.s32.totalorder %s9006_s5, %s7685_s25  ;;  %p7692_p12 = scmp.lt.u32.totalorder %s7685_s25, %s9006_s5 }
  0x3f   : > { %p7688_p10 = pnand %p7686_p4, %p8195_p8 }
  0x41   : > { %p7689_p11 = pneg %p7688_p10 }
  0x43   : > { %p7694_p13 = pnand %p7692_p12, %p7689_p11 }
  0x45   : > { %7697 = shalt.err (!%p7694_p13)
}
  0x46   : > { %s7698_s22 = scalar_lea.vmem %s8183_s26, 512  ;;  %p7706_p7 = scmp.lt.s32.totalorder %s8183_s26, %s8183_s26 }
  0x47   : > { %p7699_p0 = scmp.ne.s32.totalorder %s8183_s26, %s7698_s22  ;;  %p7707_p9 = scmp.lt.s32.totalorder %s7698_s22, %s7698_s22 }
  0x49   : > { %p7701_p2 = pnand %p7699_p0, %p8195_p8  ;;  %p7708_p4 = por %p7707_p9, %p7706_p7 }
  0x4b   : > { %p7702_p5 = pneg %p7701_p2 }
  0x4d   : > { %p7709_p10 = pnand %p7708_p4, %p7702_p5 }
  0x4f   : > { %7712 = shalt.err (!%p7709_p10)
}
  0x50   : > { %7542 = dma.hbm_to_vmem [thread:$0]  (!%p8179_p6), %s9006_s5, 512, %s8183_s26, [#allocation12], %s8062_s30, %s8062_s30, %s8063_s12  }
  0x51   : > { %s9007_s7 = sld [smem:[#allocation37_spill]] }
  0x57   : > { %s7713_s14 = scalar_lea.hbm %s9007_s7, 512 }
  0x58   : > { %p7714_p11 = scmp.ne.s32.totalorder %s9007_s7, %s7713_s14  ;;  %p7720_p0 = scmp.lt.u32.totalorder %s7713_s14, %s9007_s7 }
  0x5a   : > { %p7716_p12 = pnand %p7714_p11, %p8195_p8 }
  0x5c   : > { %p7717_p13 = pneg %p7716_p12 }
  0x5e   : > { %p7722_p2 = pnand %p7720_p0, %p7717_p13 }
  0x60   : > { %7725 = shalt.err (!%p7722_p2)
}
  0x61   : > { %s7726_s26 = scalar_lea.vmem %s8185_s29, 512  ;;  %p7734_p4 = scmp.lt.s32.totalorder %s8185_s29, %s8185_s29 }
  0x62   : > { %p7727_p5 = scmp.ne.s32.totalorder %s8185_s29, %s7726_s26  ;;  %p7735_p10 = scmp.lt.s32.totalorder %s7726_s26, %s7726_s26 }
  0x64   : > { %p7729_p7 = pnand %p7727_p5, %p8195_p8  ;;  %p7736_p11 = por %p7735_p10, %p7734_p4 }
  0x66   : > { %p7730_p9 = pneg %p7729_p7 }
  0x68   : > { %p7737_p12 = pnand %p7736_p11, %p7730_p9 }
  0x6a   : > { %7740 = shalt.err (!%p7737_p12)
}
  0x6b   : > { %7548 = dma.hbm_to_vmem [thread:$0]  (!%p8179_p6), %s9007_s7, 512, %s8185_s29, [#allocation15], %s8062_s30, %s8062_s30, %s8063_s12  }
  0x6c   : > { %s8064_s11 = smov [#allocation17]   ;;  %s9008_s9 = sld [smem:[#allocation38_spill]] }
  0x6d   : > { %s395_s24 = sshll.u32 %s8064_s11, 4  ;;  %s396_s24 = int_to_ptr.vmem [resolvable:$true] %s395_s24 }
  0x72   : > { %s7741_s15 = scalar_lea.hbm %s9008_s9, 512 }
  0x73   : > { %p7742_p13 = scmp.ne.s32.totalorder %s9008_s9, %s7741_s15  ;;  %p7748_p5 = scmp.lt.u32.totalorder %s7741_s15, %s9008_s9 }
  0x75   : > { %p7744_p0 = pnand %p7742_p13, %p8195_p8 }
  0x77   : > { %p7745_p2 = pneg %p7744_p0 }
  0x79   : > { %p7750_p7 = pnand %p7748_p5, %p7745_p2 }
  0x7b   : > { %7753 = shalt.err (!%p7750_p7)
}
  0x7c   : > { %s7754_s29 = scalar_lea.vmem %s396_s24, 512  ;;  %p7762_p11 = scmp.lt.s32.totalorder %s396_s24, %s396_s24 }
  0x7d   : > { %p7755_p9 = scmp.ne.s32.totalorder %s396_s24, %s7754_s29  ;;  %p7763_p12 = scmp.lt.s32.totalorder %s7754_s29, %s7754_s29 }
  0x7f   : > { %p7757_p4 = pnand %p7755_p9, %p8195_p8  ;;  %p7764_p1 = por %p7763_p12, %p7762_p11 }
  0x81   : > { %p7758_p10 = pneg %p7757_p4 }
  0x83   : > { %p7765_p3 = pnand %p7764_p1, %p7758_p10 }
  0x85   : > { %7768 = shalt.err (!%p7765_p3)
}
  0x86   : > { %7554 = dma.hbm_to_vmem [thread:$0]  (!%p8179_p6), %s9008_s9, 512, %s396_s24, [#allocation18], %s8062_s30, %s8062_s30, %s8063_s12  }
  0x87   : > { %s6468_s11 = sadd.s32 4294967294, %s8057_s20   ;;  %s8294_s13 = sadd.s32 1, %s8057_s20  }
  0x88   : > { %9009 = sst [smem:[#allocation30_spill]] %s8294_s13  ;;  %s38_s14 = ssub.s32 %s8057_s20, %s8294_s13 }
  0x89   : > { %s41_s15 = sadd.s32 1, %s8053_s19  ;;  %p39_p1 = scmp.eq.s32.totalorder %s38_s14, 0 }
  0x8a   : > { %p48_p3 = scmp.ne.s32.totalorder %s8053_s19, %s8049_s18  ;;  %p49_p13 = scmp.eq.s32.totalorder %s8057_s20, 0 }
  0x8b   : > { %p54_p0 = scmp.ne.s32.totalorder %s8049_s18, %s8045_s17  ;;  %p9011_p5 = scmp.eq.s32.totalorder %s8163_s23, 0 }
  0x8c   : > { %s8305_s21 = scalar_select %p39_p1, %s8053_s19, %s41_s15  }
  0x8d   : > { %p50_p2 = por %p49_p13, %p48_p3  ;;  %p8309_p7 = por %p9011_p5, %p54_p0 }
  0x8e   : > { %9010 = sst [smem:[#allocation31_spill]] %s8305_s21  ;;  %p298_p9 = scmp.eq.s32.totalorder %s8163_s23, 1 }
  0x8f   : > { %s9012_s25 = scalar_select %p8309_p7, 1, 0 }
  0x90   : > { %p304_p4 = scmp.eq.s32.totalorder %s6468_s11, 1  ;;  %p7580_p10 = scmp.lt.s32.totalorder %s8057_s20, 2 }
  0x91   : > { %s8978_s30 = sand.u32 1, %s8053_s19   ;;  %p8316_p11 = por %p298_p9, %p48_p3 }
  0x92   : > { %p8320_p12 = por %p304_p4, %p54_p0  ;;  %s8326_s28 = sshll.u32 %s8978_s30, 3 }
  0x93   : > { %s9013_s12 = scalar_select %p8316_p11, 1, 0 }
  0x94   : > { %s9014_s24 = scalar_select %p8320_p12, 1, 0 }
  0x95   : > { %s8329_s26 = sshll.u32 %s8057_s20, 7  ;;  %p8331_p1 = pnand %p7580_p10, %p50_p2 }
  0x96   : > { %9015 = sst [smem:[#allocation32_spill]] %s9014_s24  ;;  %s438_s22 = sand.u32 1, %s8057_s20  }
  0x97   : > { %s9016_s29 = scalar_select %p8331_p1, 1, 0 }
  0x98   : > { %s9017_s1 = sld [smem:[#allocation33_spill]]  ;;  %s442_s15 = scalar_lea.vmem [#allocation5], %s8326_s28 }
  0x99   : > { %s449_s30 = sshll.u32 %s442_s15, 4  ;;  %s8065_s3 = smov [#allocation10]   ;;  %s8343_s30 = int_to_ptr.vmem [resolvable:$true] %s449_s30 }
  0x9a   : > { %s8345_s5 = sshll.u32 %s8065_s3, 4  ;;  %s8347_s7 = scalar_lea.sflag [#allocation6], %s438_s22  ;;  %s338_s5 = int_to_ptr.vmem [resolvable:$true] %s8345_s5 }
  0x9b   : > { %p8353_p13 = pneg %p8331_p1 }
  0x9d   : > { %s9018_s2 = scalar_select %p8353_p13, 1, 0 }
  0x9e   : > { %s8340_s14 = scalar_lea.hbm %s9017_s1, %s8329_s26  ;;  %s7774_s21 = scalar_lea.hbm %s9017_s1, 256 }
  0x9f   : > { %s7769_s9 = scalar_lea.hbm %s8340_s14, 128  ;;  %p7775_p5 = scmp.lt.u32.totalorder %s8340_s14, %s9017_s1 }
  0xa0   : > { %p7770_p3 = scmp.ne.s32.totalorder %s8340_s14, %s7769_s9  ;;  %p7776_p9 = scmp.lt.u32.totalorder %s7774_s21, %s7769_s9 }
  0xa1   : > { %p7778_p10 = scmp.lt.u32.totalorder %s7769_s9, %s8340_s14 }
  0xa2   : > { %p7772_p0 = pnand %p8353_p13, %p7770_p3  ;;  %p7777_p4 = por %p7776_p9, %p7775_p5 }
  0xa4   : > { %p7773_p2 = pneg %p7772_p0  ;;  %p7779_p12 = por %p7778_p10, %p7777_p4 }
  0xa6   : > { %p7780_p11 = pnand %p7779_p12, %p7773_p2 }
  0xa8   : > { %7783 = shalt.err (!%p7780_p11)
}
  0xa9   : > { %s7784_s22 = scalar_lea.vmem %s8343_s30, 128  ;;  %s8066_s11 = smov [#allocation5]  }
  0xaa   : > { %p7785_p3 = scmp.ne.s32.totalorder %s8343_s30, %s7784_s22  ;;  %s7789_s15 = sshll.u32 %s8066_s11, 4  ;;  %s7790_s15 = int_to_ptr.vmem [resolvable:$false] %s7789_s15 }
  0xab   : > { %s7791_s13 = scalar_lea.vmem %s7790_s15, 256  ;;  %p7792_p6 = scmp.lt.s32.totalorder %s8343_s30, %s7790_s15 }
  0xac   : > { %p7787_p0 = pnand %p7785_p3, %p8353_p13  ;;  %p7793_p8 = scmp.lt.s32.totalorder %s7791_s13, %s7784_s22 }
  0xae   : > { %p7788_p7 = pneg %p7787_p0  ;;  %p7794_p5 = por %p7793_p8, %p7792_p6 }
  0xb0   : > { %p7795_p9 = pnand %p7794_p5, %p7788_p7 }
  0xb2   : > { %7798 = shalt.err (!%p7795_p9)
}
  0xb3   : > { %7564 = dma.hbm_to_vmem [thread:$0]  (!%p8331_p1), %s8340_s14, 128, %s8343_s30, %s8347_s7  }
  0xb4   : > { %s7799_s3 = scalar_lea.hbm %s8965_s4, 16  ;;  %p9019_p6 = scmp.ne.s32.totalorder %s9005_s16, 0 }
  0xb5   : > { %p7800_p11 = scmp.ne.s32.totalorder %s8965_s4, %s7799_s3  ;;  %p7806_p12 = scmp.lt.u32.totalorder %s7799_s3, %s8965_s4 }
  0xb7   : > { %p7802_p8 = pnand %p7800_p11, %p9019_p6 }
  0xb9   : > { %p7803_p7 = pneg %p7802_p8 }
  0xbb   : > { %p7808_p2 = pnand %p7806_p12, %p7803_p7 }
  0xbd   : > { %7811 = shalt.err (!%p7808_p2)
}
  0xbe   : > { %s7812_s13 = scalar_lea.vmem %s338_s5, 16  ;;  %s7819_s30 = scalar_lea.vmem %s338_s5, 32 }
  0xbf   : > { %p7813_p4 = scmp.ne.s32.totalorder %s338_s5, %s7812_s13  ;;  %p7820_p0 = scmp.lt.s32.totalorder %s338_s5, %s338_s5 }
  0xc0   : > { %p7821_p5 = scmp.lt.s32.totalorder %s7819_s30, %s7812_s13 }
  0xc1   : > { %p7815_p10 = pnand %p7813_p4, %p9019_p6 }
  0xc2   : > { %p7822_p9 = por %p7821_p5, %p7820_p0 }
  0xc3   : > { %p7816_p3 = pneg %p7815_p10 }
  0xc5   : > { %p7823_p1 = pnand %p7822_p9, %p7816_p3 }
  0xc7   : > { %7826 = shalt.err (!%p7823_p1)
}
  0xc8   : > { %p9020_p11 = scmp.ne.s32.totalorder %s9003_s27, 0  ;;  %s8067_s9 = smov [#allocation13]  }
  0xc9   : > { %s361_s21 = sshll.u32 %s8067_s9, 4  ;;  %s8068_s3 = smov [#allocation16]   ;;  %s362_s21 = int_to_ptr.vmem [resolvable:$true] %s361_s21 }
  0xca   : > { %7539 = dma.hbm_to_vmem [thread:$0]  (!%p9020_p11), %s8965_s4, 16, %s338_s5, [#allocation9]  }
  0xcb   : > { %s385_s11 = sshll.u32 %s8068_s3, 4  ;;  %s7827_s20 = scalar_lea.hbm %s8967_s6, 16  ;;  %s386_s11 = int_to_ptr.vmem [resolvable:$true] %s385_s11 }
  0xcc   : > { %p7828_p1 = scmp.ne.s32.totalorder %s8967_s6, %s7827_s20  ;;  %p7834_p12 = scmp.lt.u32.totalorder %s7827_s20, %s8967_s6 }
  0xce   : > { %p7830_p8 = pnand %p7828_p1, %p9019_p6 }
  0xd0   : > { %p7831_p7 = pneg %p7830_p8 }
  0xd2   : > { %p7836_p2 = pnand %p7834_p12, %p7831_p7 }
  0xd4   : > { %7839 = shalt.err (!%p7836_p2)
}
  0xd5   : > { %s7840_s5 = scalar_lea.vmem %s362_s21, 16  ;;  %s7847_s14 = scalar_lea.vmem %s362_s21, 32 }
  0xd6   : > { %p7841_p4 = scmp.ne.s32.totalorder %s362_s21, %s7840_s5  ;;  %p7848_p0 = scmp.lt.s32.totalorder %s362_s21, %s362_s21 }
  0xd7   : > { %p7849_p5 = scmp.lt.s32.totalorder %s7847_s14, %s7840_s5 }
  0xd8   : > { %p7843_p10 = pnand %p7841_p4, %p9019_p6 }
  0xd9   : > { %p7850_p9 = por %p7849_p5, %p7848_p0 }
  0xda   : > { %p7844_p3 = pneg %p7843_p10 }
  0xdc   : > { %p7851_p13 = pnand %p7850_p9, %p7844_p3 }
  0xde   : > { %7854 = shalt.err (!%p7851_p13)
}
  0xdf   : > { %7545 = dma.hbm_to_vmem [thread:$0]  (!%p9020_p11), %s8967_s6, 16, %s362_s21, [#allocation12]  }
  0xe0   : > { %s7855_s22 = scalar_lea.hbm %s8969_s8, 16 }
  0xe1   : > { %p7856_p1 = scmp.ne.s32.totalorder %s8969_s8, %s7855_s22  ;;  %p7862_p13 = scmp.lt.u32.totalorder %s7855_s22, %s8969_s8 }
  0xe3   : > { %p7858_p8 = pnand %p7856_p1, %p9019_p6 }
  0xe5   : > { %p7859_p7 = pneg %p7858_p8 }
  0xe7   : > { %p7864_p12 = pnand %p7862_p13, %p7859_p7 }
  0xe9   : > { %7867 = shalt.err (!%p7864_p12)
}
  0xea   : > { %s7868_s5 = scalar_lea.vmem %s386_s11, 16  ;;  %s7875_s21 = scalar_lea.vmem %s386_s11, 32 }
  0xeb   : > { %p7869_p2 = scmp.ne.s32.totalorder %s386_s11, %s7868_s5  ;;  %p7876_p3 = scmp.lt.s32.totalorder %s386_s11, %s386_s11 }
  0xec   : > { %p7877_p0 = scmp.lt.s32.totalorder %s7875_s21, %s7868_s5 }
  0xed   : > { %p7871_p4 = pnand %p7869_p2, %p9019_p6 }
  0xee   : > { %p7878_p5 = por %p7877_p0, %p7876_p3 }
  0xef   : > { %p7872_p10 = pneg %p7871_p4 }
  0xf1   : > { %p7879_p9 = pnand %p7878_p5, %p7872_p10 }
  0xf3   : > { %7882 = shalt.err (!%p7879_p9)
}
  0xf4   : > { %7551 = dma.hbm_to_vmem [thread:$0]  (!%p9020_p11), %s8969_s8, 16, %s386_s11, [#allocation15]  }
  0xf5   : > { %s8069_s3 = smov [#allocation19]   ;;  %s7883_s15 = scalar_lea.hbm %s8971_s10, 16 }
  0xf6   : > { %s409_s20 = sshll.u32 %s8069_s3, 4  ;;  %p7884_p1 = scmp.ne.s32.totalorder %s8971_s10, %s7883_s15  ;;  %s410_s20 = int_to_ptr.vmem [resolvable:$true] %s409_s20 }
  0xf7   : > { %p7890_p13 = scmp.lt.u32.totalorder %s7883_s15, %s8971_s10 }
  0xf8   : > { %p7886_p8 = pnand %p7884_p1, %p9019_p6 }
  0xfa   : > { %p7887_p7 = pneg %p7886_p8 }
  0xfc   : > { %p7892_p12 = pnand %p7890_p13, %p7887_p7 }
  0xfe   : > { %7895 = shalt.err (!%p7892_p12)
}
  0xff   : > { %s7896_s11 = scalar_lea.vmem %s410_s20, 16  ;;  %s7903_s21 = scalar_lea.vmem %s410_s20, 32 }
 0x100   : > { %p7897_p2 = scmp.ne.s32.totalorder %s410_s20, %s7896_s11  ;;  %p7904_p3 = scmp.lt.s32.totalorder %s410_s20, %s410_s20 }
 0x101   : > { %p7905_p0 = scmp.lt.s32.totalorder %s7903_s21, %s7896_s11 }
 0x102   : > { %p7899_p4 = pnand %p7897_p2, %p9019_p6 }
 0x103   : > { %p7906_p5 = por %p7905_p0, %p7904_p3 }
 0x104   : > { %p7900_p10 = pneg %p7899_p4 }
 0x106   : > { %p7907_p9 = pnand %p7906_p5, %p7900_p10 }
 0x108   : > { %7910 = shalt.err (!%p7907_p9)
}
 0x109   : > { %7557 = dma.hbm_to_vmem [thread:$0]  (!%p9020_p11), %s8971_s10, 16, %s410_s20, [#allocation18]  }
 0x10a   : > { %s8454_s24 = scalar_lea.hbm %s8961_s0, %s8329_s26  ;;  %s424_s22 = scalar_lea.vmem [#allocation2], %s8326_s28 }
 0x10b   : > { %s431_s15 = sshll.u32 %s424_s22, 4  ;;  %s9021_s27 = sand.u32 1, %s8053_s19   ;;  %s432_s15 = int_to_ptr.vmem [resolvable:$true] %s431_s15 }
 0x10c   : > { %s421_s13 = scalar_lea.sflag [#allocation3], %s9021_s27  ;;  %s7911_s30 = scalar_lea.hbm %s8454_s24, 128 }
 0x10d   : > { %p7912_p6 = scmp.ne.s32.totalorder %s8454_s24, %s7911_s30  ;;  %p9022_p1 = scmp.ne.s32.totalorder %s9018_s2, 0 }
 0x10e   : > { %s7916_s5 = scalar_lea.hbm %s8961_s0, 256  ;;  %p7917_p11 = scmp.lt.u32.totalorder %s8454_s24, %s8961_s0 }
 0x10f   : > { %p7914_p8 = pnand %p7912_p6, %p9022_p1  ;;  %p7918_p13 = scmp.lt.u32.totalorder %s7916_s5, %s7911_s30 }
 0x110   : > { %p7920_p2 = scmp.lt.u32.totalorder %s7911_s30, %s8454_s24 }
 0x111   : > { %p7915_p7 = pneg %p7914_p8  ;;  %p7919_p12 = por %p7918_p13, %p7917_p11 }
 0x113   : > { %p7921_p4 = por %p7920_p2, %p7919_p12 }
 0x115   : > { %p7922_p10 = pnand %p7921_p4, %p7915_p7 }
 0x117   : > { %7925 = shalt.err (!%p7922_p10)
}
 0x118   : > { %s7926_s14 = scalar_lea.vmem %s432_s15, 128  ;;  %s8070_s9 = smov [#allocation2]  }
 0x119   : > { %p7927_p3 = scmp.ne.s32.totalorder %s432_s15, %s7926_s14  ;;  %s7931_s3 = sshll.u32 %s8070_s9, 4  ;;  %s7932_s3 = int_to_ptr.vmem [resolvable:$false] %s7931_s3 }
 0x11a   : > { %s7933_s16 = scalar_lea.vmem %s7932_s3, 256  ;;  %p7934_p9 = scmp.lt.s32.totalorder %s432_s15, %s7932_s3 }
 0x11b   : > { %p7929_p0 = pnand %p7927_p3, %p9022_p1  ;;  %p7935_p6 = scmp.lt.s32.totalorder %s7933_s16, %s7926_s14 }
 0x11d   : > { %p7930_p5 = pneg %p7929_p0  ;;  %p7936_p8 = por %p7935_p6, %p7934_p9 }
 0x11f   : > { %p7937_p11 = pnand %p7936_p8, %p7930_p5 }
 0x121   : > { %7940 = shalt.err (!%p7937_p11)
}
 0x122   : > { %p9023_p13 = scmp.ne.s32.totalorder %s9016_s29, 0  ;;  %s9024_s30 = sld [smem:[#allocation34_spill]] }
 0x123   : > { %s460_s1 = scalar_lea.vmem [#allocation7], %s8326_s28 }
 0x124   : > { %7561 = dma.hbm_to_vmem [thread:$0]  (!%p9023_p13), %s8454_s24, 128, %s432_s15, %s421_s13  }
 0x125   : > { %s467_s5 = sshll.u32 %s460_s1, 4  ;;  %s468_s5 = int_to_ptr.vmem [resolvable:$true] %s467_s5 }
 0x128   : > { %s8480_s20 = scalar_lea.hbm %s9024_s30, %s8329_s26  ;;  %s7946_s24 = scalar_lea.hbm %s9024_s30, 256 }
 0x129   : > { %s7941_s11 = scalar_lea.hbm %s8480_s20, 128  ;;  %p7947_p4 = scmp.lt.u32.totalorder %s8480_s20, %s9024_s30 }
 0x12a   : > { %p7942_p7 = scmp.ne.s32.totalorder %s8480_s20, %s7941_s11  ;;  %p7948_p10 = scmp.lt.u32.totalorder %s7946_s24, %s7941_s11 }
 0x12b   : > { %p7950_p0 = scmp.lt.u32.totalorder %s7941_s11, %s8480_s20 }
 0x12c   : > { %p7944_p12 = pnand %p7942_p7, %p9022_p1  ;;  %p7949_p3 = por %p7948_p10, %p7947_p4 }
 0x12e   : > { %p7945_p2 = pneg %p7944_p12  ;;  %p7951_p5 = por %p7950_p0, %p7949_p3 }
 0x130   : > { %p7952_p9 = pnand %p7951_p5, %p7945_p2 }
 0x132   : > { %7955 = shalt.err (!%p7952_p9)
}
 0x133   : > { %s7956_s28 = scalar_lea.vmem %s468_s5, 128  ;;  %s8071_s26 = smov [#allocation7]  }
 0x134   : > { %p7957_p6 = scmp.ne.s32.totalorder %s468_s5, %s7956_s28  ;;  %s7961_s9 = sshll.u32 %s8071_s26, 4  ;;  %s7962_s9 = int_to_ptr.vmem [resolvable:$false] %s7961_s9 }
 0x135   : > { %s7963_s3 = scalar_lea.vmem %s7962_s9, 256  ;;  %p7964_p7 = scmp.lt.s32.totalorder %s468_s5, %s7962_s9 }
 0x136   : > { %p7959_p8 = pnand %p7957_p6, %p9022_p1  ;;  %p7965_p12 = scmp.lt.s32.totalorder %s7963_s3, %s7956_s28 }
 0x138   : > { %p7960_p11 = pneg %p7959_p8  ;;  %p7966_p13 = por %p7965_p12, %p7964_p7 }
 0x13a   : > { %p7967_p4 = pnand %p7966_p13, %p7960_p11 }
 0x13c   : > { %7970 = shalt.err (!%p7967_p4)
}
 0x13d   : > { %p9025_p10 = scmp.ne.s32.totalorder %s9016_s29, 0  ;;  %s9026_s16 = sld [smem:[#allocation29_spill]] }
 0x13f   : > { %7567 = dma.hbm_to_vmem [thread:$0]  (!%p9025_p10), %s8480_s20, 128, %s468_s5, %s8347_s7  }
 0x143   : > { %p9027_p2 = scmp.ne.s32.totalorder %s9026_s16, 0 }
 0x144   : > { %s8504_s2 = sand.u32 (!%p9027_p2), 1, %s8049_s18   ;;  %p9028_p1 = scmp.ne.s32.totalorder (!%p9027_p2), %s9012_s25, 0 }
 0x145   : > { %476 = sbr.rel (%p9027_p2) target bundleno = 2077 (0x81d), region = 64  ;;  %s8507_s22 = sshll.u32 (!%p9027_p2), %s8504_s2, 3 }
 0x146   : > { %s479_s27 = scalar_lea.sflag (!%p9027_p2), [#allocation3], %s8504_s2  ;;  %s482_s1 = scalar_lea.vmem (!%p9027_p2), [#allocation2], %s8507_s22 }
 0x14c   : > { %8016 = dma.done.wait (%p9028_p1), %s479_s27, 128  }
 0x14d   : > { %8018 = vsyncadd (%p9028_p1), %s479_s27, 4294967168  ;;  %s487_s7 = sand.u32 1, %s8163_s23   ;;  %s491_s20 = scalar_lea.vmem [#allocation5], %s8507_s22 }
 0x14e   : > { %s488_s29 = scalar_lea.sflag [#allocation6], %s487_s7 }
 0x14f   : > { %8020 = dma.done.wait (%p9028_p1), %s488_s29, 256  }
 0x150   : > { %8022 = vsyncadd (%p9028_p1), %s488_s29, 4294967040  ;;  %s500_s5 = scalar_lea.vmem [#allocation7], %s8507_s22  ;;  %p9029_p13 = scmp.eq.s32.totalorder %s8163_s23, 0 }
 0x152   : > { %8024 = dma.done.wait (%p9029_p13), [#allocation9], 528   ;;  %p9030_p3 = pmov %p9029_p13 }
 0x154   : > { %8026 = vsyncadd (%p9030_p3), [#allocation9], 4294966768  ;;  %p9031_p0 = pmov %p9030_p3 }
 0x156   : > { %8028 = dma.done.wait (%p9031_p0), [#allocation12], 528   ;;  %p9032_p5 = pmov %p9031_p0 }
 0x157   : > { %p9033_p9 = pmov %p9031_p0 }
 0x158   : > { %8030 = vsyncadd (%p9032_p5), [#allocation12], 4294966768 }
 0x159   : > { %8032 = dma.done.wait (%p9033_p9), [#allocation15], 528   ;;  %p9034_p6 = pmov %p9031_p0 }
 0x15a   : > { %p9035_p8 = pmov %p9031_p0 }
 0x15b   : > { %8034 = vsyncadd (%p9034_p6), [#allocation15], 4294966768 }
 0x15c   : > { %8036 = dma.done.wait (%p9035_p8), [#allocation18], 528   ;;  %p9036_p11 = pmov %p9031_p0 }
 0x15d   : > { %v8072_v0 = vmov 0.0|0.0   ;;  %vm8073_vm0 = vmmov 0   ;;  %v8074_v1 = vmov 0.0   ;;  %vm593_vm1 = vcmask 261120   ;;  %v582_v2 = vld [vmem:[#allocation8] sm:$0xff]  ;;  %v583_v3 = vld [vmem:[#allocation8 + $0x8] sm:$0xff] }
 0x15e   : > { %8038 = vsyncadd (%p9036_p11), [#allocation18], 4294966768  ;;  %7226 = vmatprep.subr.bf16.mxu1 %v8072_v0  ;;  %7244 = vmatprep.subr.bf16.mxu0 %v8072_v0  ;;  %v584_v4 = vld [vmem:[#allocation8 + $0x10] sm:$0xff]  ;;  %v598_v5 = vand.u32 4294901760, %v582_v2  ;;  %v601_v6 = vand.u32 4294901760, %v583_v3  ;;  %v585_v7 = vld [vmem:[#allocation8 + $0x18] sm:$0xff] }
 0x15f   : > { %6730 = vmatprep.mubr.msk.f32.mxu1 %vm8073_vm0, %v8074_v1  ;;  %6763 = vmatprep.mubr.msk.f32.mxu0 %vm8073_vm0, %v8074_v1  ;;  %v604_v8 = vand.u32 4294901760, %v584_v4  ;;  %v581_v9 = vld [vmem:[%s482_s1] sm:$0xff]  ;;  %v607_v10 = vand.u32 4294901760, %v585_v7  ;;  %v1083_v37 = vld [vmem:[#allocation11] sm:$0xff]  ;;  %s8075_s25 = smov 112   ;;  %s8076_s11 = smov 120  }
 0x160   : > { %v595_v11 = vsel %vm593_vm1, %v581_v9, 0  ;;  %v7227_v12 = vpack.c.bf16 %v601_v6, %v598_v5  ;;  %v8547_v13 = vsub.f32 %v582_v2, %v598_v5  ;;  %v8549_v14 = vsub.f32 %v583_v3, %v601_v6  ;;  %v1084_v38 = vld [vmem:[#allocation11 + $0x8] sm:$0xff]  ;;  %v1085_v45 = vld [vmem:[#allocation11 + $0x10] sm:$0xff]  ;;  %v1086_v46 = vld [vmem:[#allocation11 + $0x18] sm:$0xff]  ;;  %s8077_s21 = smov 104   ;;  %s8078_s14 = smov 8  }
 0x161   : > { %v8551_v15 = vsub.f32 %v584_v4, %v604_v8  ;;  %v8553_v16 = vsub.f32 %v585_v7, %v607_v10  ;;  %v8555_v17 = vand.u32 4294901760, %v595_v11  ;;  %v8557_v18 = vpack.c.bf16 %v607_v10, %v604_v8  ;;  %v1082_v39 = vld [vmem:[%s491_s20] sm:$0xff]  ;;  %s8079_s24 = smov 16   ;;  %s8080_s15 = smov 24  }
 0x162   : > { %7228 = vmatpush3.bf16.msra.mxu1 %v7227_v12  ;;  %7246 = vmatpush3.bf16.msra.mxu0 %v7227_v12  ;;  %v679_v19 = vand.u32 4294901760, %v8547_v13  ;;  %v686_v20 = vand.u32 4294901760, %v8549_v14  ;;  %v1098_v42 = vand.u32 4294901760, %v1083_v37  ;;  %v1101_v43 = vand.u32 4294901760, %v1084_v38  ;;  %s6503_s13 = sshll.u32 %s8163_s23, 7  ;;  %s580_s28 = scalar_lea.vmem [#allocation20], %s8507_s22 }
 0x163   : > { %v693_v21 = vand.u32 4294901760, %v8551_v15  ;;  %7229 = vmatprep.subr.bf16.mxu1 %v8072_v0  ;;  %7247 = vmatprep.subr.bf16.mxu0 %v8072_v0  ;;  %v8565_v22 = vsub.f32 %v595_v11, %v8555_v17  ;;  %v700_v23 = vand.u32 4294901760, %v8553_v16  ;;  %v1095_v44 = vsel %vm593_vm1, %v1082_v39, 0  ;;  %s6279_s26 = sshll.u32 %s580_s28, 4  ;;  %s9037_s16 = sld [smem:[#allocation39_spill]]  ;;  %s8918_s26 = int_to_ptr.vmem [resolvable:$true] %s6279_s26 }
 0x164   : > { %v680_v24 = vsub.f32 %v8547_v13, %v679_v19  ;;  %v687_v25 = vsub.f32 %v8549_v14, %v686_v20  ;;  %v7251_v31 = vpack.c.bf16 %v686_v20, %v679_v19  ;;  %v7239_v47 = vpack.c.bf16 %v8549_v14, %v8547_v13  ;;  %v1584_v19 = vld [vmem:[#allocation14 + $0x8] sm:$0xff]  ;;  %s6266_s1 = scalar_lea.sflag [#allocation4], %s8504_s2  ;;  %s7971_s7 = scalar_lea.vmem %s8918_s26, 128 }
 0x165   : > { %v694_v26 = vsub.f32 %v8551_v15, %v693_v21  ;;  %v668_v27 = vand.u32 4294901760, %v8565_v22  ;;  %v701_v28 = vsub.f32 %v8553_v16, %v700_v23  ;;  %v7254_v40 = vpack.c.bf16 %v700_v23, %v693_v21  ;;  %v1582_v20 = vld [vmem:[%s500_s5] sm:$0xff]  ;;  %p7972_p7 = scmp.ne.s32.totalorder %s8918_s26, %s7971_s7  ;;  %p9038_p12 = scmp.ne.s32.totalorder %s9013_s12, 0 }
 0x166   : > { %7231 = vmatpush3.bf16.msra.mxu1 %v8557_v18  ;;  %7249 = vmatpush3.bf16.msra.mxu0 %v8557_v18  ;;  %v681_v29 = vand.u32 4294901760, %v680_v24  ;;  %v688_v30 = vand.u32 4294901760, %v687_v25  ;;  %v8590_v48 = vand.u32 4294901760, %v1095_v44  ;;  %v8592_v49 = vsub.f32 %v1083_v37, %v1098_v42  ;;  %s8081_s23 = smov [#allocation20]  }
 0x167   : > { %v669_v32 = vsub.f32 %v8565_v22, %v668_v27  ;;  %7232 = vmatprep.subr.bf16.mxu1 %v8072_v0  ;;  %7250 = vmatprep.subr.bf16.mxu0 %v8072_v0  ;;  %v695_v34 = vand.u32 4294901760, %v694_v26  ;;  %v702_v35 = vand.u32 4294901760, %v701_v28  ;;  %v8594_v50 = vsub.f32 %v1084_v38, %v1101_v43  ;;  %v1585_v28 = vld [vmem:[#allocation14 + $0x10] sm:$0xff]  ;;  %p7973_p4 = pnand %p7972_p7, %p9038_p12  ;;  %s7975_s22 = sshll.u32 %s8081_s23, 4  ;;  %s7976_s22 = int_to_ptr.vmem [resolvable:$false] %s7975_s22 }
 0x168   : > { %v7233_v33 = vpack.c.bf16 %v688_v30, %v681_v29  ;;  %v1104_v51 = vand.u32 4294901760, %v1085_v45  ;;  %v1107_v52 = vand.u32 4294901760, %v1086_v46  ;;  %v7242_v53 = vpack.c.bf16 %v8553_v16, %v8551_v15  ;;  %v1586_v29 = vld [vmem:[#allocation14 + $0x18] sm:$0xff]  ;;  %s7977_s29 = scalar_lea.vmem %s7976_s22, 256  ;;  %p7978_p2 = scmp.lt.s32.totalorder %s8918_s26, %s7976_s22 }
 0x169   : > { %v670_v36 = vand.u32 4294901760, %v669_v32  ;;  %6764 = vmatmul.mubr.f32.vlgmr.msra.gmra.mrb[0].mxu0 %v668_v27  ;;  %v7236_v41 = vpack.c.bf16 %v702_v35, %v695_v34  ;;  %v1167_v54 = vsub.f32 %v1095_v44, %v8590_v48  ;;  %v1179_v57 = vand.u32 4294901760, %v8592_v49  ;;  %s8916_s27 = scalar_lea.hbm %s9037_s16, %s6503_s13  ;;  %p7974_p10 = pneg %p7973_p4 }
 0x16a   : > { %7252 = vmatpush3.bf16.msra.mxu0 %v7251_v31  ;;  %6774 = vmatprep.mubr.msk.f32.mxu0 %vm8073_vm0, %v8074_v1  ;;  %v1192_v55 = vsub.f32 %v1085_v45, %v1104_v51  ;;  %v1199_v56 = vsub.f32 %v1086_v46, %v1107_v52  ;;  %v1186_v58 = vand.u32 4294901760, %v8594_v50  ;;  %v7263_v59 = vpack.c.bf16 %v1101_v43, %v1098_v42  ;;  %p7979_p1 = scmp.lt.s32.totalorder %s7977_s29, %s7971_s7 }
 0x16b   : > { %6731 = vmatmul.mubr.f32.vlgmr.msra.gmra.mrb[0].mxu1 %v670_v36  ;;  %7253 = vmatprep.subr.bf16.mxu0 %v8072_v0  ;;  %v1168_v60 = vand.u32 4294901760, %v1167_v54  ;;  %v1180_v61 = vsub.f32 %v8592_v49, %v1179_v57  ;;  %v7266_v3 = vpack.c.bf16 %v1107_v52, %v1104_v51  ;;  %v7275_v14 = vpack.c.bf16 %v8594_v50, %v8592_v49 }
 0x16c   : > { %7234 = vmatpush3.bf16.msra.mxu1 %v7233_v33  ;;  %6741 = vmatprep.mubr.msk.f32.mxu1 %vm8073_vm0, %v8074_v1  ;;  %v1187_v62 = vsub.f32 %v8594_v50, %v1186_v58  ;;  %v1193_v63 = vand.u32 4294901760, %v1192_v55  ;;  %v1200_v2 = vand.u32 4294901760, %v1199_v56  ;;  %v7278_v15 = vpack.c.bf16 %v1199_v56, %v1192_v55  ;;  %p7980_p13 = por %p7979_p1, %p7978_p2 }
 0x16d   : > { %7235 = vmatprep.subr.bf16.mxu1 %v8072_v0  ;;  %v1169_v4 = vsub.f32 %v1167_v54, %v1168_v60  ;;  %v1181_v5 = vand.u32 4294901760, %v1180_v61  ;;  %v7287_v16 = vpack.c.bf16 %v1186_v58, %v1179_v57  ;;  %v1595_v23 = vsel %vm593_vm1, %v1582_v20, 0  ;;  %v6498_v57 = vld [vmem:[#allocation10] ss:$0 sm:$0xff] }
 0x16e   : > { %7255 = vmatpush3.bf16.msra.mxu0 %v7254_v40  ;;  %v1188_v6 = vand.u32 4294901760, %v1187_v62  ;;  %v1194_v7 = vsub.f32 %v1192_v55, %v1193_v63  ;;  %v1201_v8 = vsub.f32 %v1199_v56, %v1200_v2  ;;  %v8653_v24 = vand.u32 4294901760, %v1595_v23  ;;  %p7981_p3 = pnand %p7980_p13, %p7974_p10 }
 0x16f   : > { %7256 = vmatprep.subr.bf16.mxu0 %v8072_v0  ;;  %v1170_v9 = vand.u32 4294901760, %v1169_v4  ;;  %v1604_v31 = vand.u32 4294901760, %v1585_v28  ;;  %v1607_v32 = vand.u32 4294901760, %v1586_v29  ;;  %vm2083_vm2 = vcmask 64512  }
 0x170   : > { %7237 = vmatpush3.bf16.msra.mxu1 %v7236_v41  ;;  %v7269_v10 = vpack.c.bf16 %v1188_v6, %v1181_v5  ;;  %v1195_v11 = vand.u32 4294901760, %v1194_v7  ;;  %v1667_v30 = vsub.f32 %v1595_v23, %v8653_v24  ;;  %v6499_v6 = vld [vmem:[#allocation13] ss:$0 sm:$0xff]  ;;  %vm5761_vm3 = vcmask 130048  }
 0x171   : > { %7238 = vmatprep.subr.bf16.mxu1 %v8072_v0  ;;  %6775 = vmatmul.mubr.f32.vlgmr.msra.gmra.mrb[0].mxu0 %v8555_v17  ;;  %v7302_v36 = vpack.c.bf16 %v1607_v32, %v1604_v31  ;;  %v1692_v37 = vsub.f32 %v1585_v28, %v1604_v31  ;;  %v1699_v38 = vsub.f32 %v1586_v29, %v1607_v32  ;;  %vm5763_vm4 = vcmask 195584  }
 0x172   : > { %7258 = vmatpush3.bf16.msra.mxu0 %v7227_v12  ;;  %6785 = vmatprep.mubr.msk.f32.mxu0 %vm8073_vm0, %v8074_v1  ;;  %v1202_v12 = vand.u32 4294901760, %v1201_v8  ;;  %v1668_v35 = vand.u32 4294901760, %v1667_v30 }
 0x173   : > { %6742 = vmatmul.mubr.f32.vlgmr.msra.gmra.mrb[0].mxu1 %v8555_v17  ;;  %7259 = vmatprep.subr.bf16.mxu0 %v8072_v0  ;;  %v1693_v43 = vand.u32 4294901760, %v1692_v37  ;;  %v1700_v44 = vand.u32 4294901760, %v1699_v38 }
 0x174   : > { %7240 = vmatpush3.bf16.msra.mxu1 %v7239_v47  ;;  %6752 = vmatprep.mubr.msk.f32.mxu1 %vm8073_vm0, %v8074_v1  ;;  %v7272_v13 = vpack.c.bf16 %v1202_v12, %v1195_v11  ;;  %v1669_v40 = vsub.f32 %v1667_v30, %v1668_v35 }
 0x175   : > { %7241 = vmatprep.subr.bf16.mxu1 %v8072_v0  ;;  %v1694_v47 = vsub.f32 %v1692_v37, %v1693_v43  ;;  %v7326_v56 = vpack.c.bf16 %v1700_v44, %v1693_v43 }
 0x176   : > { %7261 = vmatpush3.bf16.msra.mxu0 %v8557_v18  ;;  %v1583_v18 = vld [vmem:[#allocation14] sm:$0xff]  ;;  %v1670_v45 = vand.u32 4294901760, %v1669_v40 }
 0x177   : > { %7298 = vmatprep.subr.bf16.mxu0 %v8072_v0  ;;  %v1598_v21 = vand.u32 4294901760, %v1583_v18  ;;  %v1695_v50 = vand.u32 4294901760, %v1694_v47 }
 0x178   : > { %7243 = vmatpush3.bf16.msra.mxu1 %v7242_v53 }
 0x179   : > { %7262 = vmatprep.subr.bf16.mxu1 %v8072_v0  ;;  %6786 = vmatmul.mubr.f32.vlgmr.msra.gmra.mrb[0].mxu0 %v8555_v17  ;;  %v7290_v17 = vpack.c.bf16 %v1200_v2, %v1193_v63  ;;  %v1678_v26 = vsub.f32 %v1583_v18, %v1598_v21 }
 0x17a   : > { %6862 = vmatprep.mubr.msk.f32.mxu0 %vm8073_vm0, %v8074_v1 }
 0x17b   : > { %6753 = vmatmul.mubr.f32.vlgmr.msra.gmra.mrb[0].mxu1 %v8565_v22  ;;  %v1601_v22 = vand.u32 4294901760, %v1584_v19  ;;  %v1679_v33 = vand.u32 4294901760, %v1678_v26 }
 0x17c   : > { %7264 = vmatpush3.bf16.msra.mxu1 %v7263_v59  ;;  %6796 = vmatprep.mubr.msk.f32.mxu1 %vm8073_vm0, %v8074_v1 }
 0x17d   : > { %7265 = vmatprep.subr.bf16.mxu1 %v8072_v0  ;;  %v7299_v25 = vpack.c.bf16 %v1601_v22, %v1598_v21  ;;  %v1685_v27 = vsub.f32 %v1584_v19, %v1601_v22  ;;  %v1680_v39 = vsub.f32 %v1678_v26, %v1679_v33 }
 0x17f   : > { %7300 = vmatpush3.bf16.msra.mxu0 %v7299_v25  ;;  %v1686_v34 = vand.u32 4294901760, %v1685_v27  ;;  %v1681_v42 = vand.u32 4294901760, %v1680_v39  ;;  %v7311_v53 = vpack.c.bf16 %v1685_v27, %v1678_v26 }
 0x180   : > { %7267 = vmatpush3.bf16.msra.mxu1 %v7266_v3  ;;  %7301 = vmatprep.subr.bf16.mxu0 %v8072_v0 }
 0x181   : > { %7268 = vmatprep.subr.bf16.mxu1 %v8072_v0  ;;  %v1687_v41 = vsub.f32 %v1685_v27, %v1686_v34  ;;  %v7323_v55 = vpack.c.bf16 %v1686_v34, %v1679_v33 }
 0x183   : > { %6797 = vmatmul.mubr.f32.vlgmr.msra.gmra.mrb[2].mxu1 %v1170_v9  ;;  %7303 = vmatpush3.bf16.msra.mxu0 %v7302_v36  ;;  %v1688_v46 = vand.u32 4294901760, %v1687_v41 }
 0x184   : > { %7270 = vmatpush3.bf16.msra.mxu1 %v7269_v10  ;;  %6807 = vmatprep.mubr.msk.f32.mxu1 %vm8073_vm0, %v8074_v1 }
 0x185   : > { %7271 = vmatprep.subr.bf16.mxu1 %v8072_v0  ;;  %7304 = vmatprep.subr.bf16.mxu0 %v8072_v0  ;;  %v7305_v49 = vpack.c.bf16 %v1688_v46, %v1681_v42  ;;  %v6500_v42 = vld [vmem:[#allocation16] ss:$0 sm:$0xff] }
 0x186   : > { %6863 = vmatmul.mubr.f32.vlgmr.msra.gmra.mrb[2].mxu0 %v1670_v45 }
 0x187   : > { %6873 = vmatprep.mubr.msk.f32.mxu0 %vm8073_vm0, %v8074_v1  ;;  %7306 = vmatpush3.bf16.msra.mxu0 %v7305_v49 }
 0x188   : > { %7273 = vmatpush3.bf16.msra.mxu1 %v7272_v13  ;;  %7307 = vmatprep.subr.bf16.mxu0 %v8072_v0 }
 0x189   : > { %7274 = vmatprep.subr.bf16.mxu1 %v8072_v0 }
 0x18b   : > { %6808 = vmatmul.mubr.f32.vlgmr.msra.gmra.mrb[2].mxu1 %v8590_v48 }
 0x18c   : > { %7276 = vmatpush3.bf16.msra.mxu1 %v7275_v14  ;;  %6818 = vmatprep.mubr.msk.f32.mxu1 %vm8073_vm0, %v8074_v1 }
 0x18d   : > { %7277 = vmatprep.subr.bf16.mxu1 %v8072_v0 }
 0x190   : > { %7279 = vmatpush3.bf16.msra.mxu1 %v7278_v15 }
 0x191   : > { %7280 = vmatprep.subr.bf16.mxu1 %v8072_v0 }
 0x193   : > { %6819 = vmatmul.mubr.f32.vlgmr.msra.gmra.mrb[2].mxu1 %v1167_v54  ;;  %v7314_v54 = vpack.c.bf16 %v1699_v38, %v1692_v37 }
 0x194   : > { %7282 = vmatpush3.bf16.msra.mxu1 %v7263_v59  ;;  %6829 = vmatprep.mubr.msk.f32.mxu1 %vm8073_vm0, %v8074_v1 }
 0x195   : > { %7283 = vmatprep.subr.bf16.mxu1 %v8072_v0 }
 0x198   : > { %7285 = vmatpush3.bf16.msra.mxu1 %v7266_v3 }
 0x199   : > { %7286 = vmatprep.subr.bf16.mxu1 %v8072_v0 }
 0x19b   : > { %6830 = vmatmul.mubr.f32.vlgmr.msra.gmra.mrb[2].mxu1 %v1168_v60 }
 0x19c   : > { %7288 = vmatpush3.bf16.msra.mxu1 %v7287_v16  ;;  %6840 = vmatprep.mubr.msk.f32.mxu1 %vm8073_vm0, %v8074_v1 }
 0x19d   : > { %7289 = vmatprep.subr.bf16.mxu1 %v8072_v0 }
 0x1a0   : > { %7291 = vmatpush3.bf16.msra.mxu1 %v7290_v17 }
 0x1a1   : > { %7292 = vmatprep.subr.bf16.mxu1 %v8072_v0 }
 0x1a3   : > { %6841 = vmatmul.mubr.f32.vlgmr.msra.gmra.mrb[2].mxu1 %v8590_v48 }
 0x1a4   : > { %7294 = vmatpush3.bf16.msra.mxu1 %v7263_v59  ;;  %6851 = vmatprep.mubr.msk.f32.mxu1 %vm8073_vm0, %v8074_v1 }
 0x1a5   : > { %7295 = vmatprep.subr.bf16.mxu1 %v8072_v0 }
 0x1a8   : > { %7297 = vmatpush3.bf16.msra.mxu1 %v7266_v3 }
 0x1a9   : > { %6920 = vmatprep.subr.mxu1 %v8074_v1 }
 0x1ab   : > { %6852 = vmatmul.mubr.f32.vlgmr.msra.gmra.mrb[2].mxu1 %v8590_v48  ;;  %v1701_v48 = vsub.f32 %v1699_v38, %v1700_v44 }
 0x1ac   : > { %6922 = vmatprep.mubr.msk.f32.mxu1 %vm8073_vm0, %v8074_v1 }
 0x1ad   : > { %v1702_v51 = vand.u32 4294901760, %v1701_v48 }
 0x1af   : > { %v7308_v52 = vpack.c.bf16 %v1702_v51, %v1695_v50 }
 0x1b1   : > { %7309 = vmatpush3.bf16.msra.mxu0 %v7308_v52 }
 0x1b2   : > { %7310 = vmatprep.subr.bf16.mxu0 %v8072_v0 }
 0x1b4   : > { %6874 = vmatmul.mubr.f32.vlgmr.msra.gmra.mrb[2].mxu0 %v8653_v24 }
 0x1b5   : > { %7312 = vmatpush3.bf16.msra.mxu0 %v7311_v53  ;;  %6884 = vmatprep.mubr.msk.f32.mxu0 %vm8073_vm0, %v8074_v1 }
 0x1b6   : > { %7313 = vmatprep.subr.bf16.mxu0 %v8072_v0 }
 0x1b9   : > { %7315 = vmatpush3.bf16.msra.mxu0 %v7314_v54 }
 0x1ba   : > { %7316 = vmatprep.subr.bf16.mxu0 %v8072_v0 }
 0x1bc   : > { %6885 = vmatmul.mubr.f32.vlgmr.msra.gmra.mrb[2].mxu0 %v1667_v30 }
 0x1bd   : > { %7318 = vmatpush3.bf16.msra.mxu0 %v7299_v25  ;;  %6895 = vmatprep.mubr.msk.f32.mxu0 %vm8073_vm0, %v8074_v1 }
 0x1be   : > { %7319 = vmatprep.subr.bf16.mxu0 %v8072_v0 }
 0x1c1   : > { %7321 = vmatpush3.bf16.msra.mxu0 %v7302_v36 }
 0x1c2   : > { %7322 = vmatprep.subr.bf16.mxu0 %v8072_v0 }
 0x1c4   : > { %6896 = vmatmul.mubr.f32.vlgmr.msra.gmra.mrb[2].mxu0 %v1668_v35 }
 0x1c5   : > { %7324 = vmatpush3.bf16.msra.mxu0 %v7323_v55  ;;  %6906 = vmatprep.mubr.msk.f32.mxu0 %vm8073_vm0, %v8074_v1 }
 0x1c6   : > { %7325 = vmatprep.subr.bf16.mxu0 %v8072_v0 }
 0x1c9   : > { %7327 = vmatpush3.bf16.msra.mxu0 %v7326_v56 }
 0x1ca   : > { %7328 = vmatprep.subr.bf16.mxu0 %v8072_v0 }
 0x1cc   : > { %6907 = vmatmul.mubr.f32.vlgmr.msra.gmra.mrb[2].mxu0 %v8653_v24 }
 0x1cd   : > { %7330 = vmatpush3.bf16.msra.mxu0 %v7299_v25  ;;  %6917 = vmatprep.mubr.msk.f32.mxu0 %vm8073_vm0, %v8074_v1 }
 0x1ce   : > { %7331 = vmatprep.subr.bf16.mxu0 %v8072_v0 }
 0x1d1   : > { %7333 = vmatpush3.bf16.msra.mxu0 %v7302_v36 }
 0x1d2   : > { %6980 = vmatprep.subr.mxu0 %v8074_v1 }
 0x1d4   : > { %6918 = vmatmul.mubr.f32.vlgmr.msra.gmra.mrb[2].mxu0 %v8653_v24 }
 0x1d5   : > { %6982 = vmatprep.mubr.msk.f32.mxu0 %vm8073_vm0, %v8074_v1 }
 0x24c   : > { %v1078_v58 = vpop.f32.mrb[0].mxu0 }
 0x24d   : > { %v6787_v59 = vpop.f32.mrb[1].mxu0 }
 0x24e   : > { %v843_v60 = vpop.f32.mrb[0].mxu1 }
 0x24f   : > { %v7370_v61 = vadd.f32 %v6498_v57, %v843_v60  ;;  %v6754_v62 = vpop.f32.mrb[1].mxu1 }
 0x251   : > { %v7371_v63 = vadd.f32 %v7370_v61, %v1078_v58 }
 0x253   : > { %v2082_v2 = vmul.f32 0.35355338, %v7371_v63 }
 0x255   : > { %3914 = vrot.lane.b32.xlu1 %v2082_v2, %s8075_s25  ;;  %2996 = vrot.lane.b32.xlu0 %v2082_v2, %s8076_s11  ;;  %v2085_v3 = vsel %vm2083_vm2, %v2082_v2, 0 }
 0x256   : > { %v2156_v4 = vand.u32 4294901760, %v2085_v3 }
 0x258   : > { %v2157_v5 = vsub.f32 %v2085_v3, %v2156_v4 }
 0x25a   : > { %v2158_v7 = vand.u32 4294901760, %v2157_v5 }
 0x25c   : > { %v2159_v12 = vsub.f32 %v2157_v5, %v2158_v7 }
 0x25e   : > { %v2160_v15 = vand.u32 4294901760, %v2159_v12 }
 0x27e   : > { %v1578_v8 = vpop.f32.mrb[2].mxu1 }
 0x27f   : > { %v7372_v9 = vadd.f32 %v6499_v6, %v1578_v8  ;;  %v6853_v10 = vpop.f32.mrb[3].mxu1 }
 0x281   : > { %3916 = vrot.lane.b32.xlu1 %v7372_v9, %s8075_s25  ;;  %2998 = vrot.lane.b32.xlu0 %v7372_v9, %s8076_s11  ;;  %v2088_v11 = vsel %vm2083_vm2, %v7372_v9, 0 }
 0x282   : > { %v2091_v13 = vand.u32 4294901760, %v2088_v11 }
 0x284   : > { %6921 = vmatpush3.xpose.msra.mxu1 %v2091_v13  ;;  %v2168_v14 = vsub.f32 %v2088_v11, %v2091_v13 }
 0x285   : > { %4833 = vrot.lane.b32.xlu1 %v7372_v9, %s8077_s21  ;;  %4831 = vrot.lane.b32.xlu0 %v2082_v2, %s8077_s21 }
 0x286   : > { %6925 = vmatprep.subr.mxu1 %v8074_v1  ;;  %v2169_v16 = vand.u32 4294901760, %v2168_v14 }
 0x287   : > { %6923 = vmatmul.mubr.f32.vlgmr.msra.gmra.mrb[4].mxu1 %v2160_v15 }
 0x288   : > { %v2170_v17 = vsub.f32 %v2168_v14, %v2169_v16  ;;  %6927 = vmatprep.mubr.msk.f32.mxu1 %vm8073_vm0, %v8074_v1 }
 0x28a   : > { %v2171_v18 = vand.u32 4294901760, %v2170_v17 }
 0x28c   : > { %6926 = vmatpush3.xpose.msra.mxu1 %v2171_v18 }
 0x28d   : > { %6930 = vmatprep.subr.mxu1 %v8074_v1 }
 0x28f   : > { %6928 = vmatmul.mubr.f32.vlgmr.msra.gmra.mrb[4].mxu1 %v2156_v4 }
 0x290   : > { %6931 = vmatpush3.xpose.msra.mxu1 %v2168_v14  ;;  %6932 = vmatprep.mubr.msk.f32.mxu1 %vm8073_vm0, %v8074_v1 }
 0x291   : > { %6935 = vmatprep.subr.mxu1 %v8074_v1 }
 0x297   : > { %6933 = vmatmul.mubr.f32.vlgmr.msra.gmra.mrb[4].mxu1 %v2157_v5 }
 0x298   : > { %6936 = vmatpush3.xpose.msra.mxu1 %v2091_v13  ;;  %6937 = vmatprep.mubr.msk.f32.mxu1 %vm8073_vm0, %v8074_v1 }
 0x299   : > { %6940 = vmatprep.subr.mxu1 %v8074_v1 }
 0x29f   : > { %6938 = vmatmul.mubr.f32.vlgmr.msra.gmra.mrb[4].mxu1 %v2158_v7 }
 0x2a0   : > { %6941 = vmatpush3.xpose.msra.mxu1 %v2169_v16  ;;  %6942 = vmatprep.mubr.msk.f32.mxu1 %vm8073_vm0, %v8074_v1 }
 0x2a1   : > { %6945 = vmatprep.subr.mxu1 %v8074_v1 }
 0x2a7   : > { %6943 = vmatmul.mubr.f32.vlgmr.msra.gmra.mrb[4].mxu1 %v2156_v4  ;;  %v2078_v44 = vpop.f32.mrb[2].mxu0 }
 0x2a8   : > { %6946 = vmatpush3.xpose.msra.mxu1 %v2091_v13  ;;  %6947 = vmatprep.mubr.msk.f32.mxu1 %vm8073_vm0, %v8074_v1  ;;  %v8729_v45 = vadd.f32 %v6500_v42, %v2078_v44  ;;  %v6919_v46 = vpop.f32.mrb[3].mxu0 }
 0x2a9   : > { %6950 = vmatprep.subr.mxu1 %v8074_v1 }
 0x2aa   : > { %v8732_v49 = vand.u32 4294901760, %v8729_v45 }
 0x2af   : > { %6948 = vmatmul.mubr.f32.vlgmr.msra.gmra.mrb[4].mxu1 %v2156_v4 }
 0x2b0   : > { %6952 = vmatprep.mubr.msk.f32.mxu1 %vm8073_vm0, %v8074_v1  ;;  %6951 = vmatpush3.msra.mxu1 %v8732_v49 }
 0x2b1   : > { %6955 = vmatprep.subr.mxu1 %v8074_v1 }
 0x2c7   : > { %v2997_v19 = vpop.permute.xlu0 %2996  ;;  %v3915_v33 = vpop.permute.xlu1 %3914 }
 0x2c8   : > { %v3000_v20 = vsel %vm2083_vm2, %v2997_v19, 0  ;;  %v3918_v35 = vsel %vm2083_vm2, %v3915_v33, 0 }
 0x2c9   : > { %v3070_v21 = vand.u32 4294901760, %v3000_v20  ;;  %v3988_v37 = vand.u32 4294901760, %v3918_v35 }
 0x2cb   : > { %v3071_v22 = vsub.f32 %v3000_v20, %v3070_v21  ;;  %v3989_v39 = vsub.f32 %v3918_v35, %v3988_v37 }
 0x2cd   : > { %v3072_v23 = vand.u32 4294901760, %v3071_v22  ;;  %v3990_v41 = vand.u32 4294901760, %v3989_v39 }
 0x2cf   : > { %v3073_v25 = vsub.f32 %v3071_v22, %v3072_v23  ;;  %v3991_v47 = vsub.f32 %v3989_v39, %v3990_v41 }
 0x2d1   : > { %v3074_v29 = vand.u32 4294901760, %v3073_v25  ;;  %v3992_v50 = vand.u32 4294901760, %v3991_v47 }
 0x2f3   : > { %v2999_v24 = vpop.permute.xlu0 %2998  ;;  %v3917_v34 = vpop.permute.xlu1 %3916 }
 0x2f4   : > { %v3002_v26 = vsel %vm2083_vm2, %v2999_v24, 0  ;;  %v3920_v36 = vsel %vm2083_vm2, %v3917_v34, 0 }
 0x2f5   : > { %v3005_v27 = vand.u32 4294901760, %v3002_v26  ;;  %v3923_v38 = vand.u32 4294901760, %v3920_v36 }
 0x2f7   : > { %v3082_v28 = vsub.f32 %v3002_v26, %v3005_v27  ;;  %6981 = vmatpush3.xpose.msra.mxu0 %v3005_v27  ;;  %v4000_v40 = vsub.f32 %v3920_v36, %v3923_v38  ;;  %v4832_v52 = vpop.permute.xlu0 %4831  ;;  %v4834_v53 = vpop.permute.xlu1 %4833 }
 0x2f8   : > { %6985 = vmatprep.subr.mxu0 %v8074_v1  ;;  %v4835_v54 = vsel %vm2083_vm2, %v4832_v52, 0  ;;  %v4837_v55 = vsel %vm2083_vm2, %v4834_v53, 0 }
 0x2f9   : > { %v3083_v30 = vand.u32 4294901760, %v3082_v28  ;;  %v4001_v43 = vand.u32 4294901760, %v4000_v40  ;;  %v4905_v56 = vand.u32 4294901760, %v4835_v54  ;;  %v4840_v57 = vand.u32 4294901760, %v4837_v55 }
 0x2fa   : > { %6983 = vmatmul.mubr.f32.vlgmr.msra.gmra.mrb[4].mxu0 %v3074_v29 }
 0x2fb   : > { %v3084_v31 = vsub.f32 %v3082_v28, %v3083_v30  ;;  %6987 = vmatprep.mubr.msk.f32.mxu0 %vm8073_vm0, %v8074_v1  ;;  %v4002_v48 = vsub.f32 %v4000_v40, %v4001_v43  ;;  %v4906_v58 = vsub.f32 %v4835_v54, %v4905_v56  ;;  %v4917_v59 = vsub.f32 %v4837_v55, %v4840_v57 }
 0x2fd   : > { %v3085_v32 = vand.u32 4294901760, %v3084_v31  ;;  %v4003_v51 = vand.u32 4294901760, %v4002_v48  ;;  %v4907_v60 = vand.u32 4294901760, %v4906_v58  ;;  %v4918_v61 = vand.u32 4294901760, %v4917_v59 }
 0x2ff   : > { %6986 = vmatpush3.xpose.msra.mxu0 %v3085_v32  ;;  %v4908_v62 = vsub.f32 %v4906_v58, %v4907_v60  ;;  %v4919_v63 = vsub.f32 %v4917_v59, %v4918_v61  ;;  %v2628_v32 = vsub.f32 %v8729_v45, %v8732_v49 }
 0x300   : > { %6990 = vmatprep.subr.mxu0 %v8074_v1 }
 0x301   : > { %v4909_v2 = vand.u32 4294901760, %v4908_v62  ;;  %v4920_v3 = vand.u32 4294901760, %v4919_v63  ;;  %v2629_v35 = vand.u32 4294901760, %v2628_v32 }
 0x302   : > { %6988 = vmatmul.mubr.f32.vlgmr.msra.gmra.mrb[4].mxu0 %v3070_v21 }
 0x303   : > { %6991 = vmatpush3.xpose.msra.mxu0 %v3082_v28  ;;  %6992 = vmatprep.mubr.msk.f32.mxu0 %vm8073_vm0, %v8074_v1 }
 0x304   : > { %6995 = vmatprep.subr.mxu0 %v8074_v1 }
 0x30a   : > { %6993 = vmatmul.mubr.f32.vlgmr.msra.gmra.mrb[4].mxu0 %v3071_v22 }
 0x30b   : > { %6996 = vmatpush3.xpose.msra.mxu0 %v3005_v27  ;;  %6997 = vmatprep.mubr.msk.f32.mxu0 %vm8073_vm0, %v8074_v1 }
 0x30c   : > { %7000 = vmatprep.subr.mxu0 %v8074_v1 }
 0x312   : > { %6998 = vmatmul.mubr.f32.vlgmr.msra.gmra.mrb[4].mxu0 %v3072_v23 }
 0x313   : > { %7001 = vmatpush3.xpose.msra.mxu0 %v3083_v30  ;;  %7002 = vmatprep.mubr.msk.f32.mxu0 %vm8073_vm0, %v8074_v1 }
 0x314   : > { %7005 = vmatprep.subr.mxu0 %v8074_v1 }
 0x31a   : > { %7003 = vmatmul.mubr.f32.vlgmr.msra.gmra.mrb[4].mxu0 %v3070_v21 }
 0x31b   : > { %7006 = vmatpush3.xpose.msra.mxu0 %v3005_v27  ;;  %7007 = vmatprep.mubr.msk.f32.mxu0 %vm8073_vm0, %v8074_v1 }
 0x31c   : > { %7040 = vmatprep.subr.mxu0 %v8074_v1 }
 0x322   : > { %7008 = vmatmul.mubr.f32.vlgmr.msra.gmra.mrb[4].mxu0 %v3070_v21 }
 0x323   : > { %7041 = vmatpush3.xpose.msra.mxu0 %v3923_v38  ;;  %7042 = vmatprep.mubr.msk.f32.mxu0 %vm8073_vm0, %v8074_v1 }
 0x324   : > { %7045 = vmatprep.subr.mxu0 %v8074_v1 }
 0x326   : > { %7043 = vmatmul.mubr.f32.vlgmr.msra.gmra.mrb[6].mxu0 %v3992_v50 }
 0x327   : > { %7046 = vmatpush3.xpose.msra.mxu0 %v4003_v51  ;;  %7047 = vmatprep.mubr.msk.f32.mxu0 %vm8073_vm0, %v8074_v1 }
 0x328   : > { %7050 = vmatprep.subr.mxu0 %v8074_v1 }
 0x32e   : > { %7048 = vmatmul.mubr.f32.vlgmr.msra.gmra.mrb[6].mxu0 %v3988_v37 }
 0x32f   : > { %7051 = vmatpush3.xpose.msra.mxu0 %v4000_v40  ;;  %7052 = vmatprep.mubr.msk.f32.mxu0 %vm8073_vm0, %v8074_v1  ;;  %v2630_v40 = vsub.f32 %v2628_v32, %v2629_v35 }
 0x330   : > { %7055 = vmatprep.subr.mxu0 %v8074_v1 }
 0x336   : > { %7053 = vmatmul.mubr.f32.vlgmr.msra.gmra.mrb[6].mxu0 %v3989_v39 }
 0x337   : > { %7056 = vmatpush3.xpose.msra.mxu0 %v3923_v38  ;;  %7057 = vmatprep.mubr.msk.f32.mxu0 %vm8073_vm0, %v8074_v1 }
 0x338   : > { %7060 = vmatprep.subr.mxu0 %v8074_v1 }
 0x33e   : > { %7058 = vmatmul.mubr.f32.vlgmr.msra.gmra.mrb[6].mxu0 %v3990_v41 }
 0x33f   : > { %7061 = vmatpush3.xpose.msra.mxu0 %v4001_v43  ;;  %7062 = vmatprep.mubr.msk.f32.mxu0 %vm8073_vm0, %v8074_v1  ;;  %v2631_v43 = vand.u32 4294901760, %v2630_v40 }
 0x340   : > { %7065 = vmatprep.subr.mxu0 %v8074_v1 }
 0x346   : > { %7063 = vmatmul.mubr.f32.vlgmr.msra.gmra.mrb[6].mxu0 %v3988_v37 }
 0x347   : > { %7066 = vmatpush3.xpose.msra.mxu0 %v3923_v38  ;;  %7067 = vmatprep.mubr.msk.f32.mxu0 %vm8073_vm0, %v8074_v1 }
 0x348   : > { %7100 = vmatprep.subr.mxu0 %v8074_v1 }
 0x34e   : > { %7068 = vmatmul.mubr.f32.vlgmr.msra.gmra.mrb[6].mxu0 %v3988_v37 }
 0x34f   : > { %7101 = vmatpush3.xpose.msra.mxu0 %v4840_v57  ;;  %7102 = vmatprep.mubr.msk.f32.mxu0 %vm8073_vm0, %v8074_v1 }
 0x350   : > { %7105 = vmatprep.subr.mxu0 %v8074_v1 }
 0x352   : > { %7103 = vmatmul.mubr.f32.vlgmr.msra.gmra.mrb[8].mxu0 %v4909_v2 }
 0x353   : > { %7106 = vmatpush3.xpose.msra.mxu0 %v4920_v3  ;;  %7107 = vmatprep.mubr.msk.f32.mxu0 %vm8073_vm0, %v8074_v1 }
 0x354   : > { %7110 = vmatprep.subr.mxu0 %v8074_v1 }
 0x35a   : > { %7108 = vmatmul.mubr.f32.vlgmr.msra.gmra.mrb[8].mxu0 %v4905_v56 }
 0x35b   : > { %7111 = vmatpush3.xpose.msra.mxu0 %v4917_v59  ;;  %7112 = vmatprep.mubr.msk.f32.mxu0 %vm8073_vm0, %v8074_v1 }
 0x35c   : > { %7115 = vmatprep.subr.mxu0 %v8074_v1 }
 0x362   : > { %7113 = vmatmul.mubr.f32.vlgmr.msra.gmra.mrb[8].mxu0 %v4906_v58 }
 0x363   : > { %7116 = vmatpush3.xpose.msra.mxu0 %v4840_v57  ;;  %7117 = vmatprep.mubr.msk.f32.mxu0 %vm8073_vm0, %v8074_v1 }
 0x364   : > { %7120 = vmatprep.subr.mxu0 %v8074_v1 }
 0x36a   : > { %7118 = vmatmul.mubr.f32.vlgmr.msra.gmra.mrb[8].mxu0 %v4907_v60 }
 0x36b   : > { %7121 = vmatpush3.xpose.msra.mxu0 %v4918_v61  ;;  %7122 = vmatprep.mubr.msk.f32.mxu0 %vm8073_vm0, %v8074_v1 }
 0x36c   : > { %7125 = vmatprep.subr.mxu0 %v8074_v1 }
 0x372   : > { %7123 = vmatmul.mubr.f32.vlgmr.msra.gmra.mrb[8].mxu0 %v4905_v56 }
 0x373   : > { %7126 = vmatpush3.xpose.msra.mxu0 %v4840_v57  ;;  %7127 = vmatprep.mubr.msk.f32.mxu0 %vm8073_vm0, %v8074_v1 }
 0x374   : > { %7334 = vmatprep.subr.bf16.mxu0 %v8072_v0 }
 0x37a   : > { %7128 = vmatmul.mubr.f32.vlgmr.msra.gmra.mrb[8].mxu0 %v4905_v56 }
 0x37b   : > { %7168 = vmatprep.mubr.msk.f32.mxu0 %vm8073_vm0, %v8074_v1 }
 0x382   : > { %v2532_v4 = vpop.f32.mrb[4].mxu1 }
 0x383   : > { %v6949_v5 = vpop.f32.mrb[5].mxu1  ;;  %v2536_v6 = vsel %vm2083_vm2, %v2532_v4, -inf }
 0x384   : > { %2537 = vmax.xlane.f32.xlu0 %v2536_v6 }
 0x3f5   : > { %v3446_v7 = vpop.f32.mrb[4].mxu0 }
 0x3f6   : > { %v7009_v8 = vpop.f32.mrb[5].mxu0  ;;  %v3450_v9 = vsel %vm2083_vm2, %v3446_v7, -inf }
 0x3f7   : > { %3451 = vmax.xlane.f32.xlu1 %v3450_v9 }
 0x411   : > { %v2538_v10 = vpop.xlane.xlu0 %2537 }
 0x412   : > { %v2539_v11 = vsub.f32 %v2532_v4, %v2538_v10 }
 0x414   : > { %v2540_v12 = vmul.f32 1.442695, %v2539_v11 }
 0x416   : > { %7641 = vpow2.f32 %v2540_v12 }
 0x420   : > { %v7642_v13 = vpop.eup %7641 }
 0x421   : > { %v4364_v14 = vpop.f32.mrb[6].mxu0  ;;  %v2542_v15 = vsel %vm2083_vm2, %v7642_v13, 0.0 }
 0x422   : > { %v7069_v16 = vpop.f32.mrb[7].mxu0  ;;  %2543 = vadd.xlane.f32.xlu0 %v2542_v15  ;;  %v4368_v17 = vsel %vm2083_vm2, %v4364_v14, -inf }
 0x426   : > { %4369 = vmax.xlane.f32.xlu0 %v4368_v17 }
 0x44d   : > { %v5281_v18 = vpop.f32.mrb[8].mxu0 }
 0x44e   : > { %v7129_v19 = vpop.f32.mrb[9].mxu0  ;;  %v5285_v20 = vsel %vm2083_vm2, %v5281_v18, -inf }
 0x44f   : > { %5286 = vmax.xlane.f32.xlu0 %v5285_v20 }
 0x484   : > { %v3452_v21 = vpop.xlane.xlu1 %3451 }
 0x485   : > { %v3453_v22 = vsub.f32 %v3446_v7, %v3452_v21 }
 0x487   : > { %v3454_v23 = vmul.f32 1.442695, %v3453_v22 }
 0x489   : > { %7643 = vpow2.f32 %v3454_v23 }
 0x493   : > { %v8781_v24 = vpop.eup %7643 }
 0x494   : > { %v3456_v25 = vsel %vm2083_vm2, %v8781_v24, 0.0 }
 0x495   : > { %3457 = vadd.xlane.f32.xlu1 %v3456_v25 }
 0x4a6   : > { %3462 = vrot.lane.b32.xlu1 %v8729_v45, %s8076_s11 }
 0x4af   : > { %v2544_v26 = vpop.xlane.xlu0 %2543 }
 0x4b0   : > { %7645 = vrcp.f32 %v2544_v26 }
 0x4b3   : > { %v4370_v27 = vpop.xlane.xlu0 %4369 }
 0x4b4   : > { %v4371_v28 = vsub.f32 %v4364_v14, %v4370_v27 }
 0x4b6   : > { %v4372_v29 = vmul.f32 1.442695, %v4371_v28 }
 0x4b8   : > { %7647 = vpow2.f32 %v4372_v29 }
 0x4ba   : > { %v7646_v30 = vpop.eup %7645 }
 0x4bb   : > { %v2546_v31 = vmul.f32 %v7646_v30, %v7642_v13 }
 0x4bd   : > { %v2548_v33 = vsel %vm2083_vm2, %v2546_v31, 0 }
 0x4be   : > { %v2616_v34 = vand.u32 4294901760, %v2548_v33 }
 0x4c0   : > { %v2617_v36 = vsub.f32 %v2548_v33, %v2616_v34 }
 0x4c2   : > { %v8790_v37 = vpop.eup %7647  ;;  %v2618_v38 = vand.u32 4294901760, %v2617_v36 }
 0x4c3   : > { %v4374_v39 = vsel %vm2083_vm2, %v8790_v37, 0.0 }
 0x4c4   : > { %4375 = vadd.xlane.f32.xlu0 %v4374_v39  ;;  %v2619_v41 = vsub.f32 %v2617_v36, %v2618_v38  ;;  %v5766_v39 = vld [vmem:[#allocation17 + $0x8] sm:$0xff] }
 0x4c6   : > { %v2620_v42 = vand.u32 4294901760, %v2619_v41  ;;  %v5783_v41 = vand.u32 4294901760, %v5766_v39 }
 0x4c8   : > { %6953 = vmatmul.mubr.f32.vlgmr.msra.gmra.mrb[6].mxu1 %v2620_v42 }
 0x4c9   : > { %6956 = vmatpush3.msra.mxu1 %v2631_v43  ;;  %6957 = vmatprep.mubr.msk.f32.mxu1 %vm8073_vm0, %v8074_v1 }
 0x4ca   : > { %6960 = vmatprep.subr.mxu1 %v8074_v1 }
 0x4d0   : > { %6958 = vmatmul.mubr.f32.vlgmr.msra.gmra.mrb[6].mxu1 %v2616_v34 }
 0x4d1   : > { %6961 = vmatpush3.msra.mxu1 %v2628_v32  ;;  %6962 = vmatprep.mubr.msk.f32.mxu1 %vm8073_vm0, %v8074_v1 }
 0x4d2   : > { %6965 = vmatprep.subr.mxu1 %v8074_v1 }
 0x4d8   : > { %6963 = vmatmul.mubr.f32.vlgmr.msra.gmra.mrb[6].mxu1 %v2617_v36 }
 0x4d9   : > { %6966 = vmatpush3.msra.mxu1 %v8732_v49  ;;  %6967 = vmatprep.mubr.msk.f32.mxu1 %vm8073_vm0, %v8074_v1 }
 0x4da   : > { %4379 = vrot.lane.b32.xlu0 %v8729_v45, %s8075_s25  ;;  %6970 = vmatprep.subr.mxu1 %v8074_v1 }
 0x4dc   : > { %v5287_v44 = vpop.xlane.xlu0 %5286 }
 0x4dd   : > { %v5288_v46 = vsub.f32 %v5281_v18, %v5287_v44  ;;  %v5867_v44 = vsub.f32 %v5766_v39, %v5783_v41 }
 0x4de   : > { %5296 = vrot.lane.b32.xlu0 %v8729_v45, %s8077_s21 }
 0x4df   : > { %v5289_v47 = vmul.f32 1.442695, %v5288_v46  ;;  %v5767_v46 = vld [vmem:[#allocation17 + $0x10] sm:$0xff] }
 0x4e0   : > { %6968 = vmatmul.mubr.f32.vlgmr.msra.gmra.mrb[6].mxu1 %v2618_v38  ;;  %v5765_v38 = vld [vmem:[#allocation17] sm:$0xff] }
 0x4e1   : > { %7649 = vpow2.f32 %v5289_v47  ;;  %6971 = vmatpush3.msra.mxu1 %v2629_v35  ;;  %6972 = vmatprep.mubr.msk.f32.mxu1 %vm8073_vm0, %v8074_v1  ;;  %v5780_v40 = vand.u32 4294901760, %v5765_v38  ;;  %v5768_v47 = vld [vmem:[#allocation17 + $0x18] sm:$0xff] }
 0x4e2   : > { %6975 = vmatprep.subr.mxu1 %v8074_v1 }
 0x4e3   : > { %v8878_v42 = vpack.c.bf16 %v5783_v41, %v5780_v40  ;;  %v5860_v43 = vsub.f32 %v5765_v38, %v5780_v40 }
 0x4e5   : > { %7336 = vmatpush3.bf16.msra.mxu0 %v8878_v42 }
 0x4e6   : > { %7337 = vmatprep.subr.bf16.mxu0 %v8072_v0 }
 0x4e8   : > { %6973 = vmatmul.mubr.f32.vlgmr.msra.gmra.mrb[6].mxu1 %v2616_v34 }
 0x4e9   : > { %6976 = vmatpush3.msra.mxu1 %v8732_v49  ;;  %6977 = vmatprep.mubr.msk.f32.mxu1 %vm8073_vm0, %v8074_v1 }
 0x4ea   : > { %7010 = vmatprep.subr.mxu1 %v8074_v1 }
 0x4eb   : > { %v8815_v48 = vpop.eup %7649 }
 0x4ec   : > { %v5291_v45 = vsel %vm2083_vm2, %v8815_v48, 0.0 }
 0x4ed   : > { %5292 = vadd.xlane.f32.xlu1 %v5291_v45  ;;  %v5789_v45 = vand.u32 4294901760, %v5768_v47 }
 0x4f0   : > { %6978 = vmatmul.mubr.f32.vlgmr.msra.gmra.mrb[6].mxu1 %v2616_v34 }
 0x4f1   : > { %7012 = vmatprep.mubr.msk.f32.mxu1 %vm8073_vm0, %v8074_v1 }
 0x522   : > { %v3458_v50 = vpop.xlane.xlu1 %3457 }
 0x523   : > { %7651 = vrcp.f32 %v3458_v50  ;;  %v5861_v50 = vand.u32 4294901760, %v5860_v43 }
 0x526   : > { %v3463_v51 = vpop.permute.xlu1 %3462 }
 0x527   : > { %v3469_v52 = vand.u32 4294901760, %v3463_v51 }
 0x529   : > { %7011 = vmatpush3.msra.mxu1 %v3469_v52  ;;  %v3546_v54 = vsub.f32 %v3463_v51, %v3469_v52  ;;  %v5868_v51 = vand.u32 4294901760, %v5867_v44 }
 0x52a   : > { %7015 = vmatprep.subr.mxu1 %v8074_v1 }
 0x52b   : > { %v3547_v57 = vand.u32 4294901760, %v3546_v54 }
 0x52d   : > { %v7652_v49 = vpop.eup %7651  ;;  %v3548_v60 = vsub.f32 %v3546_v54, %v3547_v57 }
 0x52e   : > { %v3460_v53 = vmul.f32 %v7652_v49, %v8781_v24 }
 0x52f   : > { %v3549_v63 = vand.u32 4294901760, %v3548_v60 }
 0x530   : > { %v3466_v55 = vsel %vm2083_vm2, %v3460_v53, 0  ;;  %v5881_v53 = vsub.f32 %v5768_v47, %v5789_v45 }
 0x531   : > { %v3534_v56 = vand.u32 4294901760, %v3466_v55 }
 0x533   : > { %v3535_v58 = vsub.f32 %v3466_v55, %v3534_v56  ;;  %v5869_v55 = vsub.f32 %v5867_v44, %v5868_v51 }
 0x535   : > { %v3536_v59 = vand.u32 4294901760, %v3535_v58 }
 0x537   : > { %v3537_v61 = vsub.f32 %v3535_v58, %v3536_v59 }
 0x539   : > { %v3538_v62 = vand.u32 4294901760, %v3537_v61 }
 0x53b   : > { %7013 = vmatmul.mubr.f32.vlgmr.msra.gmra.mrb[8].mxu1 %v3538_v62 }
 0x53c   : > { %7016 = vmatpush3.msra.mxu1 %v3549_v63  ;;  %7017 = vmatprep.mubr.msk.f32.mxu1 %vm8073_vm0, %v8074_v1 }
 0x53d   : > { %7020 = vmatprep.subr.mxu1 %v8074_v1 }
 0x543   : > { %7018 = vmatmul.mubr.f32.vlgmr.msra.gmra.mrb[8].mxu1 %v3534_v56 }
 0x544   : > { %7021 = vmatpush3.msra.mxu1 %v3546_v54  ;;  %7022 = vmatprep.mubr.msk.f32.mxu1 %vm8073_vm0, %v8074_v1  ;;  %v5862_v54 = vsub.f32 %v5860_v43, %v5861_v50 }
 0x545   : > { %7025 = vmatprep.subr.mxu1 %v8074_v1 }
 0x54b   : > { %7023 = vmatmul.mubr.f32.vlgmr.msra.gmra.mrb[8].mxu1 %v3535_v58  ;;  %v5882_v58 = vand.u32 4294901760, %v5881_v53 }
 0x54c   : > { %7026 = vmatpush3.msra.mxu1 %v3469_v52  ;;  %7027 = vmatprep.mubr.msk.f32.mxu1 %vm8073_vm0, %v8074_v1 }
 0x54d   : > { %7030 = vmatprep.subr.mxu1 %v8074_v1  ;;  %v5883_v62 = vsub.f32 %v5881_v53, %v5882_v58 }
 0x551   : > { %v4376_v2 = vpop.xlane.xlu0 %4375 }
 0x552   : > { %7653 = vrcp.f32 %v4376_v2 }
 0x553   : > { %7028 = vmatmul.mubr.f32.vlgmr.msra.gmra.mrb[8].mxu1 %v3536_v59  ;;  %v5870_v59 = vand.u32 4294901760, %v5869_v55 }
 0x554   : > { %7031 = vmatpush3.msra.mxu1 %v3547_v57  ;;  %7032 = vmatprep.mubr.msk.f32.mxu1 %vm8073_vm0, %v8074_v1 }
 0x555   : > { %7035 = vmatprep.subr.mxu1 %v8074_v1  ;;  %v4380_v3 = vpop.permute.xlu0 %4379 }
 0x556   : > { %v4386_v4 = vand.u32 4294901760, %v4380_v3 }
 0x558   : > { %v4463_v7 = vsub.f32 %v4380_v3, %v4386_v4 }
 0x559   : > { %v5297_v18 = vpop.permute.xlu0 %5296 }
 0x55a   : > { %v4464_v10 = vand.u32 4294901760, %v4463_v7  ;;  %v5303_v20 = vand.u32 4294901760, %v5297_v18 }
 0x55b   : > { %7033 = vmatmul.mubr.f32.vlgmr.msra.gmra.mrb[8].mxu1 %v3534_v56 }
 0x55c   : > { %v7654_v5 = vpop.eup %7653  ;;  %7036 = vmatpush3.msra.mxu1 %v3469_v52  ;;  %7037 = vmatprep.mubr.msk.f32.mxu1 %vm8073_vm0, %v8074_v1  ;;  %v4465_v13 = vsub.f32 %v4463_v7, %v4464_v10  ;;  %v5380_v23 = vsub.f32 %v5297_v18, %v5303_v20 }
 0x55d   : > { %v4378_v6 = vmul.f32 %v7654_v5, %v8790_v37  ;;  %7070 = vmatprep.subr.mxu1 %v8074_v1 }
 0x55e   : > { %v4466_v16 = vand.u32 4294901760, %v4465_v13  ;;  %v5381_v26 = vand.u32 4294901760, %v5380_v23 }
 0x55f   : > { %v4383_v8 = vsel %vm2083_vm2, %v4378_v6, 0  ;;  %v7347_v6 = vpack.c.bf16 %v5867_v44, %v5860_v43 }
 0x560   : > { %v4451_v9 = vand.u32 4294901760, %v4383_v8  ;;  %v5382_v29 = vsub.f32 %v5380_v23, %v5381_v26 }
 0x562   : > { %v4452_v11 = vsub.f32 %v4383_v8, %v4451_v9  ;;  %v5383_v31 = vand.u32 4294901760, %v5382_v29  ;;  %v7359_v8 = vpack.c.bf16 %v5868_v51, %v5861_v50 }
 0x563   : > { %7038 = vmatmul.mubr.f32.vlgmr.msra.gmra.mrb[8].mxu1 %v3534_v56  ;;  %v5863_v56 = vand.u32 4294901760, %v5862_v54 }
 0x564   : > { %7071 = vmatpush3.msra.mxu1 %v4386_v4  ;;  %7072 = vmatprep.mubr.msk.f32.mxu1 %vm8073_vm0, %v8074_v1  ;;  %v4453_v12 = vand.u32 4294901760, %v4452_v11 }
 0x565   : > { %7075 = vmatprep.subr.mxu1 %v8074_v1  ;;  %v7341_v2 = vpack.c.bf16 %v5870_v59, %v5863_v56 }
 0x566   : > { %v4454_v14 = vsub.f32 %v4452_v11, %v4453_v12 }
 0x568   : > { %v4455_v15 = vand.u32 4294901760, %v4454_v14 }
 0x56a   : > { %7073 = vmatmul.mubr.f32.vlgmr.msra.gmra.mrb[10].mxu1 %v4455_v15 }
 0x56b   : > { %7076 = vmatpush3.msra.mxu1 %v4466_v16  ;;  %7077 = vmatprep.mubr.msk.f32.mxu1 %vm8073_vm0, %v8074_v1 }
 0x56c   : > { %7080 = vmatprep.subr.mxu1 %v8074_v1 }
 0x572   : > { %7078 = vmatmul.mubr.f32.vlgmr.msra.gmra.mrb[10].mxu1 %v4451_v9 }
 0x573   : > { %7081 = vmatpush3.msra.mxu1 %v4463_v7  ;;  %7082 = vmatprep.mubr.msk.f32.mxu1 %vm8073_vm0, %v8074_v1 }
 0x574   : > { %7085 = vmatprep.subr.mxu1 %v8074_v1 }
 0x57a   : > { %v5293_v17 = vpop.xlane.xlu1 %5292  ;;  %7083 = vmatmul.mubr.f32.vlgmr.msra.gmra.mrb[10].mxu1 %v4452_v11 }
 0x57b   : > { %7655 = vrcp.f32 %v5293_v17  ;;  %7086 = vmatpush3.msra.mxu1 %v4386_v4  ;;  %7087 = vmatprep.mubr.msk.f32.mxu1 %vm8073_vm0, %v8074_v1 }
 0x57c   : > { %7090 = vmatprep.subr.mxu1 %v8074_v1 }
 0x582   : > { %7088 = vmatmul.mubr.f32.vlgmr.msra.gmra.mrb[10].mxu1 %v4453_v12 }
 0x583   : > { %7091 = vmatpush3.msra.mxu1 %v4464_v10  ;;  %7092 = vmatprep.mubr.msk.f32.mxu1 %vm8073_vm0, %v8074_v1 }
 0x584   : > { %7095 = vmatprep.subr.mxu1 %v8074_v1 }
 0x585   : > { %v7656_v19 = vpop.eup %7655 }
 0x586   : > { %v5295_v21 = vmul.f32 %v7656_v19, %v8815_v48  ;;  %v5786_v48 = vand.u32 4294901760, %v5767_v46 }
 0x588   : > { %v5300_v22 = vsel %vm2083_vm2, %v5295_v21, 0  ;;  %v8882_v52 = vpack.c.bf16 %v5789_v45, %v5786_v48  ;;  %v5874_v49 = vsub.f32 %v5767_v46, %v5786_v48 }
 0x589   : > { %v5368_v24 = vand.u32 4294901760, %v5300_v22 }
 0x58a   : > { %7093 = vmatmul.mubr.f32.vlgmr.msra.gmra.mrb[10].mxu1 %v4451_v9  ;;  %7339 = vmatpush3.bf16.msra.mxu0 %v8882_v52  ;;  %v5875_v57 = vand.u32 4294901760, %v5874_v49  ;;  %v7350_v7 = vpack.c.bf16 %v5881_v53, %v5874_v49 }
 0x58b   : > { %7096 = vmatpush3.msra.mxu1 %v4386_v4  ;;  %7097 = vmatprep.mubr.msk.f32.mxu1 %vm8073_vm0, %v8074_v1  ;;  %v5369_v25 = vsub.f32 %v5300_v22, %v5368_v24  ;;  %v5884_v4 = vand.u32 4294901760, %v5883_v62  ;;  %v6501_v22 = vld [vmem:[#allocation19] ss:$0 sm:$0xff] }
 0x58c   : > { %7130 = vmatprep.subr.mxu1 %v8074_v1  ;;  %7340 = vmatprep.subr.bf16.mxu0 %v8072_v0  ;;  %v5876_v61 = vsub.f32 %v5874_v49, %v5875_v57 }
 0x58d   : > { %v5370_v27 = vand.u32 4294901760, %v5369_v25 }
 0x58e   : > { %v5877_v3 = vand.u32 4294901760, %v5876_v61 }
 0x58f   : > { %v5371_v28 = vsub.f32 %v5369_v25, %v5370_v27 }
 0x590   : > { %v7344_v5 = vpack.c.bf16 %v5884_v4, %v5877_v3 }
 0x591   : > { %v5372_v30 = vand.u32 4294901760, %v5371_v28 }
 0x592   : > { %7098 = vmatmul.mubr.f32.vlgmr.msra.gmra.mrb[10].mxu1 %v4451_v9  ;;  %v7362_v9 = vpack.c.bf16 %v5882_v58, %v5875_v57 }
 0x593   : > { %7131 = vmatpush3.msra.mxu1 %v5303_v20  ;;  %7132 = vmatprep.mubr.msk.f32.mxu1 %vm8073_vm0, %v8074_v1 }
 0x594   : > { %7135 = vmatprep.subr.mxu1 %v8074_v1 }
 0x596   : > { %7133 = vmatmul.mubr.f32.vlgmr.msra.gmra.mrb[12].mxu1 %v5372_v30 }
 0x597   : > { %7136 = vmatpush3.msra.mxu1 %v5383_v31  ;;  %7137 = vmatprep.mubr.msk.f32.mxu1 %vm8073_vm0, %v8074_v1 }
 0x598   : > { %7140 = vmatprep.subr.mxu1 %v8074_v1 }
 0x59e   : > { %7138 = vmatmul.mubr.f32.vlgmr.msra.gmra.mrb[12].mxu1 %v5368_v24 }
 0x59f   : > { %7141 = vmatpush3.msra.mxu1 %v5380_v23  ;;  %7142 = vmatprep.mubr.msk.f32.mxu1 %vm8073_vm0, %v8074_v1 }
 0x5a0   : > { %7145 = vmatprep.subr.mxu1 %v8074_v1 }
 0x5a6   : > { %7143 = vmatmul.mubr.f32.vlgmr.msra.gmra.mrb[12].mxu1 %v5369_v25 }
 0x5a7   : > { %7146 = vmatpush3.msra.mxu1 %v5303_v20  ;;  %7147 = vmatprep.mubr.msk.f32.mxu1 %vm8073_vm0, %v8074_v1 }
 0x5a8   : > { %7150 = vmatprep.subr.mxu1 %v8074_v1 }
 0x5ae   : > { %7148 = vmatmul.mubr.f32.vlgmr.msra.gmra.mrb[12].mxu1 %v5370_v27 }
 0x5af   : > { %7151 = vmatpush3.msra.mxu1 %v5381_v26  ;;  %7152 = vmatprep.mubr.msk.f32.mxu1 %vm8073_vm0, %v8074_v1 }
 0x5b0   : > { %7155 = vmatprep.subr.mxu1 %v8074_v1 }
 0x5b6   : > { %7153 = vmatmul.mubr.f32.vlgmr.msra.gmra.mrb[12].mxu1 %v5368_v24 }
 0x5b7   : > { %7156 = vmatpush3.msra.mxu1 %v5303_v20  ;;  %7157 = vmatprep.mubr.msk.f32.mxu1 %vm8073_vm0, %v8074_v1 }
 0x5be   : > { %7158 = vmatmul.mubr.f32.vlgmr.msra.gmra.mrb[12].mxu1 %v5368_v24 }
 0x5c3   : > { %v2992_v32 = vpop.f32.mrb[6].mxu1 }
 0x5c4   : > { %v6979_v33 = vpop.f32.mrb[7].mxu1 }
 0x636   : > { %v3910_v34 = vpop.f32.mrb[8].mxu1 }
 0x637   : > { %5749 = vrot.lane.b32.xlu0 %v3910_v34, %s8078_s14  ;;  %v7039_v35 = vpop.f32.mrb[9].mxu1 }
 0x665   : > { %v4827_v36 = vpop.f32.mrb[10].mxu1 }
 0x666   : > { %5753 = vrot.lane.b32.xlu0 %v4827_v36, %s8079_s24  ;;  %v7099_v37 = vpop.f32.mrb[11].mxu1 }
 0x691   : > { %v5744_v60 = vpop.f32.mrb[12].mxu1 }
 0x692   : > { %5757 = vrot.lane.b32.xlu0 %v5744_v60, %s8080_s15  ;;  %v7159_v63 = vpop.f32.mrb[13].mxu1 }
 0x6a9   : > { %v5750_v10 = vpop.permute.xlu0 %5749 }
 0x6aa   : > { %v5760_v12 = vsel %vm2083_vm2, %v2992_v32, %v5750_v10 }
 0x6d8   : > { %v5754_v11 = vpop.permute.xlu0 %5753 }
 0x6d9   : > { %v5762_v13 = vsel %vm5761_vm3, %v5760_v12, %v5754_v11 }
 0x704   : > { %v5758_v14 = vpop.permute.xlu0 %5757 }
 0x705   : > { %v5764_v15 = vsel %vm5763_vm4, %v5762_v13, %v5758_v14 }
 0x706   : > { %v5777_v16 = vsel %vm593_vm1, %v5764_v15, 0 }
 0x707   : > { %v5848_v17 = vand.u32 4294901760, %v5777_v16 }
 0x709   : > { %v5849_v18 = vsub.f32 %v5777_v16, %v5848_v17 }
 0x70b   : > { %v5850_v19 = vand.u32 4294901760, %v5849_v18 }
 0x70d   : > { %v5851_v20 = vsub.f32 %v5849_v18, %v5850_v19 }
 0x70f   : > { %v5852_v21 = vand.u32 4294901760, %v5851_v20 }
 0x711   : > { %7169 = vmatmul.mubr.f32.vlgmr.msra.gmra.mrb[10].mxu0 %v5852_v21 }
 0x712   : > { %7342 = vmatpush3.bf16.msra.mxu0 %v7341_v2  ;;  %7179 = vmatprep.mubr.msk.f32.mxu0 %vm8073_vm0, %v8074_v1 }
 0x713   : > { %7343 = vmatprep.subr.bf16.mxu0 %v8072_v0 }
 0x716   : > { %7345 = vmatpush3.bf16.msra.mxu0 %v7344_v5 }
 0x717   : > { %7346 = vmatprep.subr.bf16.mxu0 %v8072_v0 }
 0x719   : > { %7180 = vmatmul.mubr.f32.vlgmr.msra.gmra.mrb[10].mxu0 %v5848_v17 }
 0x71a   : > { %7348 = vmatpush3.bf16.msra.mxu0 %v7347_v6  ;;  %7190 = vmatprep.mubr.msk.f32.mxu0 %vm8073_vm0, %v8074_v1 }
 0x71b   : > { %7349 = vmatprep.subr.bf16.mxu0 %v8072_v0 }
 0x71e   : > { %7351 = vmatpush3.bf16.msra.mxu0 %v7350_v7 }
 0x71f   : > { %7352 = vmatprep.subr.bf16.mxu0 %v8072_v0 }
 0x721   : > { %7191 = vmatmul.mubr.f32.vlgmr.msra.gmra.mrb[10].mxu0 %v5849_v18 }
 0x722   : > { %7354 = vmatpush3.bf16.msra.mxu0 %v8878_v42  ;;  %7201 = vmatprep.mubr.msk.f32.mxu0 %vm8073_vm0, %v8074_v1 }
 0x723   : > { %7355 = vmatprep.subr.bf16.mxu0 %v8072_v0 }
 0x726   : > { %7357 = vmatpush3.bf16.msra.mxu0 %v8882_v52 }
 0x727   : > { %7358 = vmatprep.subr.bf16.mxu0 %v8072_v0 }
 0x729   : > { %7202 = vmatmul.mubr.f32.vlgmr.msra.gmra.mrb[10].mxu0 %v5850_v19 }
 0x72a   : > { %7360 = vmatpush3.bf16.msra.mxu0 %v7359_v8  ;;  %7212 = vmatprep.mubr.msk.f32.mxu0 %vm8073_vm0, %v8074_v1 }
 0x72b   : > { %7361 = vmatprep.subr.bf16.mxu0 %v8072_v0 }
 0x72e   : > { %7363 = vmatpush3.bf16.msra.mxu0 %v7362_v9 }
 0x72f   : > { %7364 = vmatprep.subr.bf16.mxu0 %v8072_v0 }
 0x731   : > { %7213 = vmatmul.mubr.f32.vlgmr.msra.gmra.mrb[10].mxu0 %v5848_v17 }
 0x732   : > { %7366 = vmatpush3.bf16.msra.mxu0 %v8878_v42  ;;  %7223 = vmatprep.mubr.msk.f32.mxu0 %vm8073_vm0, %v8074_v1 }
 0x733   : > { %7367 = vmatprep.subr.bf16.mxu0 %v8072_v0 }
 0x736   : > { %7369 = vmatpush3.bf16.msra.mxu0 %v8882_v52 }
 0x739   : > { %7224 = vmatmul.mubr.f32.vlgmr.msra.gmra.mrb[10].mxu0 %v5848_v17 }
 0x80c   : > { %v6260_v23 = vpop.f32.mrb[10].mxu0 }
 0x80d   : > { %v7374_v24 = vadd.f32 %v6501_v22, %v6260_v23  ;;  %v7225_v25 = vpop.f32.mrb[11].mxu0 }
 0x80f   : > { %6264 = vst.msk [vmem:[%s580_s28] sm:$0xff] %vm593_vm1, %v7374_v24 }
 0x810   : > { %7984 = shalt.err (!%p7981_p3)
}
 0x811   : > { %s7985_s2 = scalar_lea.hbm %s8916_s27, 128  ;;  %s7989_s25 = scalar_lea.hbm %s9037_s16, 256 }
 0x812   : > { %p7986_p0 = scmp.ne.s32.totalorder %s8916_s27, %s7985_s2  ;;  %p7990_p6 = scmp.lt.u32.totalorder %s8916_s27, %s9037_s16 }
 0x813   : > { %p7991_p8 = scmp.lt.u32.totalorder %s7989_s25, %s7985_s2  ;;  %p7993_p7 = scmp.lt.u32.totalorder %s7985_s2, %s8916_s27 }
 0x814   : > { %p7987_p5 = pnand %p7986_p0, %p9038_p12 }
 0x815   : > { %p7992_p11 = por %p7991_p8, %p7990_p6 }
 0x816   : > { %p7988_p9 = pneg %p7987_p5 }
 0x817   : > { %p7994_p4 = por %p7993_p7, %p7992_p11 }
 0x819   : > { %p7995_p10 = pnand %p7994_p4, %p7988_p9 }
 0x81b   : > { %7998 = shalt.err (!%p7995_p10)
}
 0x81c   : > { %7531 = dma.vmem_to_hbm [thread:$0]  (%p9038_p12), %s8918_s26, 128, %s8916_s27, %s6266_s1  }
 0x81d PF: > { %s9039_s14 = sld [smem:[#allocation32_spill]]  ;;  %s9040_s24 = sld [smem:[#allocation28_spill]] }
 0x81e   : > { %s6291_s15 = sand.u32 1, %s8045_s17  }
 0x81f   : > { %s6292_s13 = scalar_lea.sflag [#allocation4], %s6291_s15 }
 0x823   : > { %p9041_p2 = scmp.ne.s32.totalorder %s9039_s14, 0  ;;  %p9042_p1 = scmp.ge.s32.totalorder %s9040_s24, 2 }
 0x825   : > { %p7569_p13 = pnand %p9042_p1, %p9041_p2 }
 0x827   : > { %8040 = dma.done.wait (!%p7569_p13), %s6292_s13, 128  }
 0x828   : > { %8042 = vsyncadd (!%p7569_p13), %s6292_s13, 4294967168  ;;  %s9043_s20 = sld [smem:[#allocation30_spill]]  ;;  %s9044_s28 = sld [smem:[#allocation31_spill]] }
 0x829   : > { %s9045_s17 = smov %s8049_s18  ;;  %s9046_s18 = smov %s8053_s19 }
 0x82e   : > { %p31_p3 = scmp.ge.s32.totalorder %s9043_s20, 4   ;;  %s9047_s19 = smov %s9044_s28 }
 0x830   :  { %33 = sbr.rel (!%p31_p3) target bundleno = 19 (0x13), region = 165 }
 0x837   :  { %6297 = vsyncpa [#allocation3], 1 }
 0x838   :  { %6299 = vsyncpa [#allocation3 + $0x1], 1 }
 0x839   :  { %6300 = vsyncpa [#allocation6], 1 }
 0x83a   :  { %6302 = vsyncpa [#allocation6 + $0x1], 1 }
 0x83b   :  { %6303 = vsyncpa [#allocation9], 1 }
 0x83c   :  { %6304 = vsyncpa [#allocation12], 1 }
 0x83d   :  { %6305 = vsyncpa [#allocation15], 1 }
 0x83e   :  { %6306 = vsyncpa [#allocation18], 1 }
 0x83f   :  { %6307 = vsyncpa [#allocation4], 1 }
 0x840   :  { %6309 = vsyncpa [#allocation4 + $0x1], 1 }

</bundles_post_ra>
